<compile_context>
chip_gen: v7x
topology: tpu7x:2x2x1
jax: 0.10.0
libtpu: 0.0.40
codegen_flags: <defaults>
</compile_context>

<pallas_src>
import math
import functools

import jax
import jax.numpy as jnp
from jax import lax
from jax.experimental import pallas as pl
from jax.experimental.pallas import tpu as pltpu  # noqa: F401  (kept for TPU-specific knobs)

# ----------------------------- small BERT config -----------------------------
VOCAB_SIZE = 100
TYPE_VOCAB = 2
MAX_POS = 16
HIDDEN = 32
NUM_HEADS = 2
HEAD_DIM = HIDDEN // NUM_HEADS
INTERMEDIATE = 64
NUM_LAYERS = 2
LN_EPS = 1e-12

BATCH = 2
SEQ = 8


# ------------------------------- kernel helpers ------------------------------
def _layernorm(x, gamma, beta):
    mean = jnp.mean(x, axis=-1, keepdims=True)
    var = jnp.mean((x - mean) ** 2, axis=-1, keepdims=True)
    return (x - mean) * lax.rsqrt(var + LN_EPS) * gamma + beta


# ------------------------- fused encoder (single kernel) ----------------------
def encoder_kernel(
    word_ref, pos_ref, typ_ref, mask_ref,
    emb_g_ref, emb_b_ref,
    wqkv_ref, bqkv_ref, wo_ref, bo_ref,
    ln1_g_ref, ln1_b_ref, w1_ref, b1_ref,
    w2_ref, b2_ref, ln2_g_ref, ln2_b_ref,
    out_ref,
):
    """Gridless body.  word/pos/typ: (B*S, H).  mask: (B, 1, S) additive.
    Weights are (L, ...) stacks fully resident in VMEM; out: (B*S, H)."""
    scale = 1.0 / math.sqrt(HEAD_DIM)

    # ---- embeddings add + embedding LayerNorm (hidden state stays in vregs) ----
    x = _layernorm(word_ref[...] + pos_ref[...] + typ_ref[...],
                   emb_g_ref[...], emb_b_ref[...])                      # (BS, H) f32

    # ---- fully unrolled layer loop (all weights VMEM-resident, no streaming) ----
    for l in range(NUM_LAYERS):
        # fused QKV projection: one (BS,H) x (H,3H) bf16 MXU op, f32 accumulation
        qkv = jnp.dot(x.astype(jnp.bfloat16), wqkv_ref[l],
                      preferred_element_type=jnp.float32) + bqkv_ref[l]  # (BS, 3H)
        q = qkv[:, :HIDDEN]
        k = qkv[:, HIDDEN:2 * HIDDEN]
        v = qkv[:, 2 * HIDDEN:]

        # attention on tiny (S, HD) tiles per (batch, head); heads re-assembled
        # on the lane axis so the output projection is a single full-width matmul
        ctx_rows = []
        for b in range(BATCH):
            r = b * SEQ
            mask_b = mask_ref[b]                                         # (1, S)
            head_ctx = []
            for h in range(NUM_HEADS):
                c = h * HEAD_DIM
                qh = q[r:r + SEQ, c:c + HEAD_DIM]                        # (S, HD)
                kh = k[r:r + SEQ, c:c + HEAD_DIM]
                vh = v[r:r + SEQ, c:c + HEAD_DIM]
                s = jnp.dot(qh, kh.T, preferred_element_type=jnp.float32)
                s = s * scale + mask_b                                   # (S, S)
                s = s - jnp.max(s, axis=-1, keepdims=True)
                p = jnp.exp(s)
                # approx reciprocal runs on the EUP slot; approx=False for exact parity
                p = p * pl.reciprocal(jnp.sum(p, axis=-1, keepdims=True), approx=True)
                head_ctx.append(jnp.dot(p, vh, preferred_element_type=jnp.float32))
            ctx_rows.append(jnp.concatenate(head_ctx, axis=-1))          # (S, H)
        ctx = jnp.concatenate(ctx_rows, axis=0)                          # (BS, H)

        # output projection: one (BS,H) x (H,H) matmul (no cross-head reduction)
        attn = jnp.dot(ctx.astype(jnp.bfloat16), wo_ref[l],
                       preferred_element_type=jnp.float32) + bo_ref[l]
        h1 = _layernorm(x + attn, ln1_g_ref[l], ln1_b_ref[l])

        # feed-forward
        ff = jnp.dot(h1.astype(jnp.bfloat16), w1_ref[l],
                     preferred_element_type=jnp.float32) + b1_ref[l]     # (BS, I)
        # TODO(synk): HF BERT/PubMedBERT uses exact erf-GELU; tanh approximation used here.
        ff = jax.nn.gelu(ff, approximate=True)
        ff = jnp.dot(ff.astype(jnp.bfloat16), w2_ref[l],
                     preferred_element_type=jnp.float32) + b2_ref[l]     # (BS, H)

        x = _layernorm(h1 + ff, ln2_g_ref[l], ln2_b_ref[l])

    out_ref[...] = x                                                     # single writeback


def fused_encoder(word2d, pos2d, typ2d, add_mask, params):
    BS, H = word2d.shape
    lp = params["layers"]
    # Gridless pallas_call: every operand is a whole-array VMEM block (default specs),
    # total footprint ~70 KB, so no pipelining / streaming is needed at this scale.
    return pl.pallas_call(
        encoder_kernel,
        out_shape=jax.ShapeDtypeStruct((BS, H), jnp.float32),
    )(
        word2d, pos2d, typ2d, add_mask,
        params["emb_ln_g"], params["emb_ln_b"],
        lp["wqkv"], lp["bqkv"], lp["wo"], lp["bo"],
        lp["ln1_g"], lp["ln1_b"], lp["w1"], lp["b1"],
        lp["w2"], lp["b2"], lp["ln2_g"], lp["ln2_b"],
    )


# ------------------------------ parameter init --------------------------------
def init_params(key):
    def dense(k, shape):
        return jax.random.normal(k, shape, jnp.float32) * 0.02

    keys = jax.random.split(key, 3 + 6 * NUM_LAYERS)
    params = {
        "word_emb": dense(keys[0], (VOCAB_SIZE, HIDDEN)),
        "pos_emb": dense(keys[1], (MAX_POS, HIDDEN)),
        "type_emb": dense(keys[2], (TYPE_VOCAB, HIDDEN)),
        "emb_ln_g": jnp.ones((1, HIDDEN), jnp.float32),
        "emb_ln_b": jnp.zeros((1, HIDDEN), jnp.float32),
    }

    wqkv, wo, w1, w2 = [], [], [], []
    kidx = 3
    for _ in range(NUM_LAYERS):
        lk = keys[kidx:kidx + 6]
        kidx += 6
        # fused QKV weight: heads occupy contiguous HD-sized column blocks (BERT layout)
        wqkv.append(jnp.concatenate(
            [dense(lk[0], (HIDDEN, HIDDEN)),
             dense(lk[1], (HIDDEN, HIDDEN)),
             dense(lk[2], (HIDDEN, HIDDEN))], axis=1))                  # (H, 3H)
        wo.append(dense(lk[3], (HIDDEN, HIDDEN)))                       # (H, H)
        w1.append(dense(lk[4], (HIDDEN, INTERMEDIATE)))
        w2.append(dense(lk[5], (INTERMEDIATE, HIDDEN)))

    L = NUM_LAYERS
    params["layers"] = {
        # matmul weights stored in bf16 (MXU operands); biases / LN params stay f32
        "wqkv": jnp.stack(wqkv).astype(jnp.bfloat16),
        "bqkv": jnp.zeros((L, 1, 3 * HIDDEN), jnp.float32),
        "wo": jnp.stack(wo).astype(jnp.bfloat16),
        "bo": jnp.zeros((L, 1, HIDDEN), jnp.float32),
        "ln1_g": jnp.ones((L, 1, HIDDEN), jnp.float32),
        "ln1_b": jnp.zeros((L, 1, HIDDEN), jnp.float32),
        "w1": jnp.stack(w1).astype(jnp.bfloat16),
        "b1": jnp.zeros((L, 1, INTERMEDIATE), jnp.float32),
        "w2": jnp.stack(w2).astype(jnp.bfloat16),
        "b2": jnp.zeros((L, 1, HIDDEN), jnp.float32),
        "ln2_g": jnp.ones((L, 1, HIDDEN), jnp.float32),
        "ln2_b": jnp.zeros((L, 1, HIDDEN), jnp.float32),
    }
    return params


# ------------------------------ BaseEncoder.forward ---------------------------
@functools.partial(jax.jit, static_argnames=("output_cls",))
def base_encoder_forward(params, input_ids, attention_mask, token_type_ids,
                         output_cls=False):
    B, S = input_ids.shape
    # embedding table gathers stay in plain JAX; add + LN + layers run in the fused kernel
    word = jnp.take(params["word_emb"], input_ids, axis=0).reshape(B * S, HIDDEN)
    typ = jnp.take(params["type_emb"], token_type_ids, axis=0).reshape(B * S, HIDDEN)
    pos = jnp.tile(params["pos_emb"][:S], (B, 1))                        # (B*S, H)

    # additive attention mask: 0 where attended, -1e9 where masked, shape (B, 1, S)
    add_mask = ((1.0 - attention_mask.astype(jnp.float32)) * -1e9)[:, None, :]

    x = fused_encoder(word, pos, typ, add_mask, params).reshape(B, S, HIDDEN)

    if output_cls:
        return x[:, 0, :]          # CLS token
    return x                       # last_hidden_state


# --------------------------------- main ----------------------------------------
if __name__ == "__main__":
    key = jax.random.PRNGKey(0)
    pkey, ikey = jax.random.split(key)

    params = init_params(pkey)

    input_ids = jax.random.randint(ikey, (BATCH, SEQ), 0, VOCAB_SIZE, dtype=jnp.int32)
    attention_mask = jnp.ones((BATCH, SEQ), jnp.int32).at[1, 6:].set(0)  # ragged mask
    token_type_ids = jnp.zeros((BATCH, SEQ), jnp.int32)

    # Single forward pass; CLS output is a slice of the already-computed sequence output
    # (avoids a second kernel run / second jit specialization).
    seq_out = base_encoder_forward(params, input_ids, attention_mask,
                                   token_type_ids, output_cls=False)
    jax.block_until_ready(seq_out)
    cls_out = seq_out[:, 0, :]

    assert seq_out.shape == (BATCH, SEQ, HIDDEN)
    assert cls_out.shape == (BATCH, HIDDEN)
    assert bool(jnp.all(jnp.isfinite(seq_out)))
    print("KERNEL_OK")
</pallas_src>

<mosaic_0001>
module attributes {stable_mosaic.version = 11 : i64} {
  func.func @encoder_kernel(%arg0: memref<16x32xf32, #tpu.memory_space<vmem>>, %arg1: memref<16x32xf32, #tpu.memory_space<vmem>>, %arg2: memref<16x32xf32, #tpu.memory_space<vmem>>, %arg3: memref<2x1x8xf32, #tpu.memory_space<vmem>>, %arg4: memref<1x32xf32, #tpu.memory_space<vmem>>, %arg5: memref<1x32xf32, #tpu.memory_space<vmem>>, %arg6: memref<2x32x96xbf16, #tpu.memory_space<vmem>>, %arg7: memref<2x1x96xf32, #tpu.memory_space<vmem>>, %arg8: memref<2x32x32xbf16, #tpu.memory_space<vmem>>, %arg9: memref<2x1x32xf32, #tpu.memory_space<vmem>>, %arg10: memref<2x1x32xf32, #tpu.memory_space<vmem>>, %arg11: memref<2x1x32xf32, #tpu.memory_space<vmem>>, %arg12: memref<2x32x64xbf16, #tpu.memory_space<vmem>>, %arg13: memref<2x1x64xf32, #tpu.memory_space<vmem>>, %arg14: memref<2x64x32xbf16, #tpu.memory_space<vmem>>, %arg15: memref<2x1x32xf32, #tpu.memory_space<vmem>>, %arg16: memref<2x1x32xf32, #tpu.memory_space<vmem>>, %arg17: memref<2x1x32xf32, #tpu.memory_space<vmem>>, %arg18: memref<16x32xf32, #tpu.memory_space<vmem>>) attributes {dimension_semantics = [], scalar_prefetch = 0 : i64, scratch_operands = 0 : i64, tpu.core_type = #tpu.core_type<tc>} {
    %c0 = arith.constant 0 : index
    %c0_0 = arith.constant 0 : index
    %0 = vector.load %arg0[%c0, %c0_0] : memref<16x32xf32, #tpu.memory_space<vmem>>, vector<16x32xf32>
    %c0_1 = arith.constant 0 : index
    %c0_2 = arith.constant 0 : index
    %1 = vector.load %arg1[%c0_1, %c0_2] : memref<16x32xf32, #tpu.memory_space<vmem>>, vector<16x32xf32>
    %2 = arith.addf %0, %1 : vector<16x32xf32>
    %c0_3 = arith.constant 0 : index
    %c0_4 = arith.constant 0 : index
    %3 = vector.load %arg2[%c0_3, %c0_4] : memref<16x32xf32, #tpu.memory_space<vmem>>, vector<16x32xf32>
    %4 = arith.addf %2, %3 : vector<16x32xf32>
    %c0_5 = arith.constant 0 : index
    %c0_6 = arith.constant 0 : index
    %5 = vector.load %arg4[%c0_5, %c0_6] : memref<1x32xf32, #tpu.memory_space<vmem>>, vector<1x32xf32>
    %c0_7 = arith.constant 0 : index
    %c0_8 = arith.constant 0 : index
    %6 = vector.load %arg5[%c0_7, %c0_8] : memref<1x32xf32, #tpu.memory_space<vmem>>, vector<1x32xf32>
    %cst = arith.constant dense<0.000000e+00> : vector<16xf32>
    %7 = vector.multi_reduction <add>, %4, %cst [1] : vector<16x32xf32> to vector<16xf32>
    %8 = vector.shape_cast %7 : vector<16xf32> to vector<16x1xf32>
    %cst_9 = arith.constant 3.200000e+01 : f32
    %9 = vector.broadcast %cst_9 : f32 to vector<16x1xf32>
    %10 = arith.divf %8, %9 : vector<16x1xf32>
    %11 = vector.broadcast %10 : vector<16x1xf32> to vector<16x32xf32>
    %12 = arith.subf %4, %11 : vector<16x32xf32>
    %13 = arith.mulf %12, %12 : vector<16x32xf32>
    %cst_10 = arith.constant dense<0.000000e+00> : vector<16xf32>
    %14 = vector.multi_reduction <add>, %13, %cst_10 [1] : vector<16x32xf32> to vector<16xf32>
    %15 = vector.shape_cast %14 : vector<16xf32> to vector<16x1xf32>
    %cst_11 = arith.constant 3.200000e+01 : f32
    %16 = vector.broadcast %cst_11 : f32 to vector<16x1xf32>
    %17 = arith.divf %15, %16 : vector<16x1xf32>
    %18 = vector.broadcast %10 : vector<16x1xf32> to vector<16x32xf32>
    %19 = arith.subf %4, %18 : vector<16x32xf32>
    %cst_12 = arith.constant 9.99999996E-13 : f32
    %20 = vector.broadcast %cst_12 : f32 to vector<16x1xf32>
    %21 = arith.addf %17, %20 : vector<16x1xf32>
    %22 = math.rsqrt %21 : vector<16x1xf32>
    %23 = vector.broadcast %22 : vector<16x1xf32> to vector<16x32xf32>
    %24 = arith.mulf %19, %23 : vector<16x32xf32>
    %25 = vector.broadcast %5 : vector<1x32xf32> to vector<16x32xf32>
    %26 = arith.mulf %24, %25 : vector<16x32xf32>
    %27 = vector.broadcast %6 : vector<1x32xf32> to vector<16x32xf32>
    %28 = arith.addf %26, %27 : vector<16x32xf32>
    %29 = arith.truncf %28 : vector<16x32xf32> to vector<16x32xbf16>
    %c0_13 = arith.constant 0 : index
    %c0_14 = arith.constant 0 : index
    %c0_15 = arith.constant 0 : index
    %30 = vector.load %arg6[%c0_13, %c0_14, %c0_15] : memref<2x32x96xbf16, #tpu.memory_space<vmem>>, vector<1x32x96xbf16>
    %31 = vector.shape_cast %30 : vector<1x32x96xbf16> to vector<32x96xbf16>
    %cst_16 = arith.constant dense<0.000000e+00> : vector<16x96xf32>
    %32 = tpu.matmul %29, %31, %cst_16 {dimension_numbers = #tpu.dot_dimension_numbers<[1], [0], [0], [1], [0, 0, 1, 1], [], []>} : vector<16x32xbf16>, vector<32x96xbf16>, vector<16x96xf32> -> vector<16x96xf32>
    %c0_17 = arith.constant 0 : index
    %c0_18 = arith.constant 0 : index
    %c0_19 = arith.constant 0 : index
    %33 = vector.load %arg7[%c0_17, %c0_18, %c0_19] : memref<2x1x96xf32, #tpu.memory_space<vmem>>, vector<1x1x96xf32>
    %34 = vector.shape_cast %33 : vector<1x1x96xf32> to vector<1x96xf32>
    %35 = vector.broadcast %34 : vector<1x96xf32> to vector<16x96xf32>
    %36 = arith.addf %32, %35 : vector<16x96xf32>
    %37 = vector.extract_strided_slice %36 {offsets = [0, 0], sizes = [16, 32], strides = [1, 1]} : vector<16x96xf32> to vector<16x32xf32>
    %38 = vector.extract_strided_slice %36 {offsets = [0, 32], sizes = [16, 32], strides = [1, 1]} : vector<16x96xf32> to vector<16x32xf32>
    %39 = vector.extract_strided_slice %36 {offsets = [0, 64], sizes = [16, 32], strides = [1, 1]} : vector<16x96xf32> to vector<16x32xf32>
    %c0_20 = arith.constant 0 : index
    %c0_21 = arith.constant 0 : index
    %c0_22 = arith.constant 0 : index
    %40 = vector.load %arg3[%c0_20, %c0_21, %c0_22] : memref<2x1x8xf32, #tpu.memory_space<vmem>>, vector<1x1x8xf32>
    %41 = vector.shape_cast %40 : vector<1x1x8xf32> to vector<1x8xf32>
    %42 = vector.extract_strided_slice %37 {offsets = [0, 0], sizes = [8, 16], strides = [1, 1]} : vector<16x32xf32> to vector<8x16xf32>
    %43 = vector.extract_strided_slice %38 {offsets = [0, 0], sizes = [8, 16], strides = [1, 1]} : vector<16x32xf32> to vector<8x16xf32>
    %44 = vector.extract_strided_slice %39 {offsets = [0, 0], sizes = [8, 16], strides = [1, 1]} : vector<16x32xf32> to vector<8x16xf32>
    %45 = tpu.transpose %43, [1, 0] : vector<8x16xf32> -> vector<16x8xf32>
    %cst_23 = arith.constant dense<0.000000e+00> : vector<8x8xf32>
    %46 = tpu.matmul %42, %45, %cst_23 {dimension_numbers = #tpu.dot_dimension_numbers<[1], [0], [0], [1], [0, 0, 1, 1], [], []>} : vector<8x16xf32>, vector<16x8xf32>, vector<8x8xf32> -> vector<8x8xf32>
    %cst_24 = arith.constant 2.500000e-01 : f32
    %47 = vector.broadcast %cst_24 : f32 to vector<8x8xf32>
    %48 = arith.mulf %46, %47 : vector<8x8xf32>
    %49 = vector.broadcast %41 : vector<1x8xf32> to vector<8x8xf32>
    %50 = arith.addf %48, %49 : vector<8x8xf32>
    %cst_25 = arith.constant dense<0xFF800000> : vector<8xf32>
    %51 = vector.multi_reduction <maximumf>, %50, %cst_25 [1] : vector<8x8xf32> to vector<8xf32>
    %52 = vector.shape_cast %51 : vector<8xf32> to vector<8x1xf32>
    %53 = vector.broadcast %52 : vector<8x1xf32> to vector<8x8xf32>
    %54 = arith.subf %50, %53 : vector<8x8xf32>
    %55 = math.exp %54 : vector<8x8xf32>
    %cst_26 = arith.constant dense<0.000000e+00> : vector<8xf32>
    %56 = vector.multi_reduction <add>, %55, %cst_26 [1] : vector<8x8xf32> to vector<8xf32>
    %57 = vector.shape_cast %56 : vector<8xf32> to vector<8x1xf32>
    %58 = tpu.reciprocal %57 {approx = true} : vector<8x1xf32> -> vector<8x1xf32>
    %59 = vector.broadcast %58 : vector<8x1xf32> to vector<8x8xf32>
    %60 = arith.mulf %55, %59 : vector<8x8xf32>
    %cst_27 = arith.constant dense<0.000000e+00> : vector<8x16xf32>
    %61 = tpu.matmul %60, %44, %cst_27 {dimension_numbers = #tpu.dot_dimension_numbers<[1], [0], [0], [1], [0, 0, 1, 1], [], []>} : vector<8x8xf32>, vector<8x16xf32>, vector<8x16xf32> -> vector<8x16xf32>
    %62 = vector.extract_strided_slice %37 {offsets = [0, 16], sizes = [8, 16], strides = [1, 1]} : vector<16x32xf32> to vector<8x16xf32>
    %63 = vector.extract_strided_slice %38 {offsets = [0, 16], sizes = [8, 16], strides = [1, 1]} : vector<16x32xf32> to vector<8x16xf32>
    %64 = vector.extract_strided_slice %39 {offsets = [0, 16], sizes = [8, 16], strides = [1, 1]} : vector<16x32xf32> to vector<8x16xf32>
    %65 = tpu.transpose %63, [1, 0] : vector<8x16xf32> -> vector<16x8xf32>
    %cst_28 = arith.constant dense<0.000000e+00> : vector<8x8xf32>
    %66 = tpu.matmul %62, %65, %cst_28 {dimension_numbers = #tpu.dot_dimension_numbers<[1], [0], [0], [1], [0, 0, 1, 1], [], []>} : vector<8x16xf32>, vector<16x8xf32>, vector<8x8xf32> -> vector<8x8xf32>
    %cst_29 = arith.constant 2.500000e-01 : f32
    %67 = vector.broadcast %cst_29 : f32 to vector<8x8xf32>
    %68 = arith.mulf %66, %67 : vector<8x8xf32>
    %69 = vector.broadcast %41 : vector<1x8xf32> to vector<8x8xf32>
    %70 = arith.addf %68, %69 : vector<8x8xf32>
    %cst_30 = arith.constant dense<0xFF800000> : vector<8xf32>
    %71 = vector.multi_reduction <maximumf>, %70, %cst_30 [1] : vector<8x8xf32> to vector<8xf32>
    %72 = vector.shape_cast %71 : vector<8xf32> to vector<8x1xf32>
    %73 = vector.broadcast %72 : vector<8x1xf32> to vector<8x8xf32>
    %74 = arith.subf %70, %73 : vector<8x8xf32>
    %75 = math.exp %74 : vector<8x8xf32>
    %cst_31 = arith.constant dense<0.000000e+00> : vector<8xf32>
    %76 = vector.multi_reduction <add>, %75, %cst_31 [1] : vector<8x8xf32> to vector<8xf32>
    %77 = vector.shape_cast %76 : vector<8xf32> to vector<8x1xf32>
    %78 = tpu.reciprocal %77 {approx = true} : vector<8x1xf32> -> vector<8x1xf32>
    %79 = vector.broadcast %78 : vector<8x1xf32> to vector<8x8xf32>
    %80 = arith.mulf %75, %79 : vector<8x8xf32>
    %cst_32 = arith.constant dense<0.000000e+00> : vector<8x16xf32>
    %81 = tpu.matmul %80, %64, %cst_32 {dimension_numbers = #tpu.dot_dimension_numbers<[1], [0], [0], [1], [0, 0, 1, 1], [], []>} : vector<8x8xf32>, vector<8x16xf32>, vector<8x16xf32> -> vector<8x16xf32>
    %82 = tpu.concatenate %61, %81 in 1 : vector<8x16xf32>, vector<8x16xf32> -> vector<8x32xf32>
    %c1 = arith.constant 1 : index
    %c0_33 = arith.constant 0 : index
    %c0_34 = arith.constant 0 : index
    %83 = vector.load %arg3[%c1, %c0_33, %c0_34] : memref<2x1x8xf32, #tpu.memory_space<vmem>>, vector<1x1x8xf32>
    %84 = vector.shape_cast %83 : vector<1x1x8xf32> to vector<1x8xf32>
    %85 = vector.extract_strided_slice %37 {offsets = [8, 0], sizes = [8, 16], strides = [1, 1]} : vector<16x32xf32> to vector<8x16xf32>
    %86 = vector.extract_strided_slice %38 {offsets = [8, 0], sizes = [8, 16], strides = [1, 1]} : vector<16x32xf32> to vector<8x16xf32>
    %87 = vector.extract_strided_slice %39 {offsets = [8, 0], sizes = [8, 16], strides = [1, 1]} : vector<16x32xf32> to vector<8x16xf32>
    %88 = tpu.transpose %86, [1, 0] : vector<8x16xf32> -> vector<16x8xf32>
    %cst_35 = arith.constant dense<0.000000e+00> : vector<8x8xf32>
    %89 = tpu.matmul %85, %88, %cst_35 {dimension_numbers = #tpu.dot_dimension_numbers<[1], [0], [0], [1], [0, 0, 1, 1], [], []>} : vector<8x16xf32>, vector<16x8xf32>, vector<8x8xf32> -> vector<8x8xf32>
    %cst_36 = arith.constant 2.500000e-01 : f32
    %90 = vector.broadcast %cst_36 : f32 to vector<8x8xf32>
    %91 = arith.mulf %89, %90 : vector<8x8xf32>
    %92 = vector.broadcast %84 : vector<1x8xf32> to vector<8x8xf32>
    %93 = arith.addf %91, %92 : vector<8x8xf32>
    %cst_37 = arith.constant dense<0xFF800000> : vector<8xf32>
    %94 = vector.multi_reduction <maximumf>, %93, %cst_37 [1] : vector<8x8xf32> to vector<8xf32>
    %95 = vector.shape_cast %94 : vector<8xf32> to vector<8x1xf32>
    %96 = vector.broadcast %95 : vector<8x1xf32> to vector<8x8xf32>
    %97 = arith.subf %93, %96 : vector<8x8xf32>
    %98 = math.exp %97 : vector<8x8xf32>
    %cst_38 = arith.constant dense<0.000000e+00> : vector<8xf32>
    %99 = vector.multi_reduction <add>, %98, %cst_38 [1] : vector<8x8xf32> to vector<8xf32>
    %100 = vector.shape_cast %99 : vector<8xf32> to vector<8x1xf32>
    %101 = tpu.reciprocal %100 {approx = true} : vector<8x1xf32> -> vector<8x1xf32>
    %102 = vector.broadcast %101 : vector<8x1xf32> to vector<8x8xf32>
    %103 = arith.mulf %98, %102 : vector<8x8xf32>
    %cst_39 = arith.constant dense<0.000000e+00> : vector<8x16xf32>
    %104 = tpu.matmul %103, %87, %cst_39 {dimension_numbers = #tpu.dot_dimension_numbers<[1], [0], [0], [1], [0, 0, 1, 1], [], []>} : vector<8x8xf32>, vector<8x16xf32>, vector<8x16xf32> -> vector<8x16xf32>
    %105 = vector.extract_strided_slice %37 {offsets = [8, 16], sizes = [8, 16], strides = [1, 1]} : vector<16x32xf32> to vector<8x16xf32>
    %106 = vector.extract_strided_slice %38 {offsets = [8, 16], sizes = [8, 16], strides = [1, 1]} : vector<16x32xf32> to vector<8x16xf32>
    %107 = vector.extract_strided_slice %39 {offsets = [8, 16], sizes = [8, 16], strides = [1, 1]} : vector<16x32xf32> to vector<8x16xf32>
    %108 = tpu.transpose %106, [1, 0] : vector<8x16xf32> -> vector<16x8xf32>
    %cst_40 = arith.constant dense<0.000000e+00> : vector<8x8xf32>
    %109 = tpu.matmul %105, %108, %cst_40 {dimension_numbers = #tpu.dot_dimension_numbers<[1], [0], [0], [1], [0, 0, 1, 1], [], []>} : vector<8x16xf32>, vector<16x8xf32>, vector<8x8xf32> -> vector<8x8xf32>
    %cst_41 = arith.constant 2.500000e-01 : f32
    %110 = vector.broadcast %cst_41 : f32 to vector<8x8xf32>
    %111 = arith.mulf %109, %110 : vector<8x8xf32>
    %112 = vector.broadcast %84 : vector<1x8xf32> to vector<8x8xf32>
    %113 = arith.addf %111, %112 : vector<8x8xf32>
    %cst_42 = arith.constant dense<0xFF800000> : vector<8xf32>
    %114 = vector.multi_reduction <maximumf>, %113, %cst_42 [1] : vector<8x8xf32> to vector<8xf32>
    %115 = vector.shape_cast %114 : vector<8xf32> to vector<8x1xf32>
    %116 = vector.broadcast %115 : vector<8x1xf32> to vector<8x8xf32>
    %117 = arith.subf %113, %116 : vector<8x8xf32>
    %118 = math.exp %117 : vector<8x8xf32>
    %cst_43 = arith.constant dense<0.000000e+00> : vector<8xf32>
    %119 = vector.multi_reduction <add>, %118, %cst_43 [1] : vector<8x8xf32> to vector<8xf32>
    %120 = vector.shape_cast %119 : vector<8xf32> to vector<8x1xf32>
    %121 = tpu.reciprocal %120 {approx = true} : vector<8x1xf32> -> vector<8x1xf32>
    %122 = vector.broadcast %121 : vector<8x1xf32> to vector<8x8xf32>
    %123 = arith.mulf %118, %122 : vector<8x8xf32>
    %cst_44 = arith.constant dense<0.000000e+00> : vector<8x16xf32>
    %124 = tpu.matmul %123, %107, %cst_44 {dimension_numbers = #tpu.dot_dimension_numbers<[1], [0], [0], [1], [0, 0, 1, 1], [], []>} : vector<8x8xf32>, vector<8x16xf32>, vector<8x16xf32> -> vector<8x16xf32>
    %125 = tpu.concatenate %104, %124 in 1 : vector<8x16xf32>, vector<8x16xf32> -> vector<8x32xf32>
    %126 = tpu.concatenate %82, %125 in 0 : vector<8x32xf32>, vector<8x32xf32> -> vector<16x32xf32>
    %127 = arith.truncf %126 : vector<16x32xf32> to vector<16x32xbf16>
    %c0_45 = arith.constant 0 : index
    %c0_46 = arith.constant 0 : index
    %c0_47 = arith.constant 0 : index
    %128 = vector.load %arg8[%c0_45, %c0_46, %c0_47] : memref<2x32x32xbf16, #tpu.memory_space<vmem>>, vector<1x32x32xbf16>
    %129 = vector.shape_cast %128 : vector<1x32x32xbf16> to vector<32x32xbf16>
    %cst_48 = arith.constant dense<0.000000e+00> : vector<16x32xf32>
    %130 = tpu.matmul %127, %129, %cst_48 {dimension_numbers = #tpu.dot_dimension_numbers<[1], [0], [0], [1], [0, 0, 1, 1], [], []>} : vector<16x32xbf16>, vector<32x32xbf16>, vector<16x32xf32> -> vector<16x32xf32>
    %c0_49 = arith.constant 0 : index
    %c0_50 = arith.constant 0 : index
    %c0_51 = arith.constant 0 : index
    %131 = vector.load %arg9[%c0_49, %c0_50, %c0_51] : memref<2x1x32xf32, #tpu.memory_space<vmem>>, vector<1x1x32xf32>
    %132 = vector.shape_cast %131 : vector<1x1x32xf32> to vector<1x32xf32>
    %133 = vector.broadcast %132 : vector<1x32xf32> to vector<16x32xf32>
    %134 = arith.addf %130, %133 : vector<16x32xf32>
    %135 = arith.addf %28, %134 : vector<16x32xf32>
    %c0_52 = arith.constant 0 : index
    %c0_53 = arith.constant 0 : index
    %c0_54 = arith.constant 0 : index
    %136 = vector.load %arg10[%c0_52, %c0_53, %c0_54] : memref<2x1x32xf32, #tpu.memory_space<vmem>>, vector<1x1x32xf32>
    %137 = vector.shape_cast %136 : vector<1x1x32xf32> to vector<1x32xf32>
    %c0_55 = arith.constant 0 : index
    %c0_56 = arith.constant 0 : index
    %c0_57 = arith.constant 0 : index
    %138 = vector.load %arg11[%c0_55, %c0_56, %c0_57] : memref<2x1x32xf32, #tpu.memory_space<vmem>>, vector<1x1x32xf32>
    %139 = vector.shape_cast %138 : vector<1x1x32xf32> to vector<1x32xf32>
    %cst_58 = arith.constant dense<0.000000e+00> : vector<16xf32>
    %140 = vector.multi_reduction <add>, %135, %cst_58 [1] : vector<16x32xf32> to vector<16xf32>
    %141 = vector.shape_cast %140 : vector<16xf32> to vector<16x1xf32>
    %cst_59 = arith.constant 3.200000e+01 : f32
    %142 = vector.broadcast %cst_59 : f32 to vector<16x1xf32>
    %143 = arith.divf %141, %142 : vector<16x1xf32>
    %144 = vector.broadcast %143 : vector<16x1xf32> to vector<16x32xf32>
    %145 = arith.subf %135, %144 : vector<16x32xf32>
    %146 = arith.mulf %145, %145 : vector<16x32xf32>
    %cst_60 = arith.constant dense<0.000000e+00> : vector<16xf32>
    %147 = vector.multi_reduction <add>, %146, %cst_60 [1] : vector<16x32xf32> to vector<16xf32>
    %148 = vector.shape_cast %147 : vector<16xf32> to vector<16x1xf32>
    %cst_61 = arith.constant 3.200000e+01 : f32
    %149 = vector.broadcast %cst_61 : f32 to vector<16x1xf32>
    %150 = arith.divf %148, %149 : vector<16x1xf32>
    %151 = vector.broadcast %143 : vector<16x1xf32> to vector<16x32xf32>
    %152 = arith.subf %135, %151 : vector<16x32xf32>
    %cst_62 = arith.constant 9.99999996E-13 : f32
    %153 = vector.broadcast %cst_62 : f32 to vector<16x1xf32>
    %154 = arith.addf %150, %153 : vector<16x1xf32>
    %155 = math.rsqrt %154 : vector<16x1xf32>
    %156 = vector.broadcast %155 : vector<16x1xf32> to vector<16x32xf32>
    %157 = arith.mulf %152, %156 : vector<16x32xf32>
    %158 = vector.broadcast %137 : vector<1x32xf32> to vector<16x32xf32>
    %159 = arith.mulf %157, %158 : vector<16x32xf32>
    %160 = vector.broadcast %139 : vector<1x32xf32> to vector<16x32xf32>
    %161 = arith.addf %159, %160 : vector<16x32xf32>
    %162 = arith.truncf %161 : vector<16x32xf32> to vector<16x32xbf16>
    %c0_63 = arith.constant 0 : index
    %c0_64 = arith.constant 0 : index
    %c0_65 = arith.constant 0 : index
    %163 = vector.load %arg12[%c0_63, %c0_64, %c0_65] : memref<2x32x64xbf16, #tpu.memory_space<vmem>>, vector<1x32x64xbf16>
    %164 = vector.shape_cast %163 : vector<1x32x64xbf16> to vector<32x64xbf16>
    %cst_66 = arith.constant dense<0.000000e+00> : vector<16x64xf32>
    %165 = tpu.matmul %162, %164, %cst_66 {dimension_numbers = #tpu.dot_dimension_numbers<[1], [0], [0], [1], [0, 0, 1, 1], [], []>} : vector<16x32xbf16>, vector<32x64xbf16>, vector<16x64xf32> -> vector<16x64xf32>
    %c0_67 = arith.constant 0 : index
    %c0_68 = arith.constant 0 : index
    %c0_69 = arith.constant 0 : index
    %166 = vector.load %arg13[%c0_67, %c0_68, %c0_69] : memref<2x1x64xf32, #tpu.memory_space<vmem>>, vector<1x1x64xf32>
    %167 = vector.shape_cast %166 : vector<1x1x64xf32> to vector<1x64xf32>
    %168 = vector.broadcast %167 : vector<1x64xf32> to vector<16x64xf32>
    %169 = arith.addf %165, %168 : vector<16x64xf32>
    %170 = arith.mulf %169, %169 : vector<16x64xf32>
    %171 = arith.mulf %169, %170 : vector<16x64xf32>
    %cst_70 = arith.constant 4.471500e-02 : f32
    %172 = vector.broadcast %cst_70 : f32 to vector<16x64xf32>
    %173 = arith.mulf %172, %171 : vector<16x64xf32>
    %174 = arith.addf %169, %173 : vector<16x64xf32>
    %cst_71 = arith.constant 0.797884583 : f32
    %175 = vector.broadcast %cst_71 : f32 to vector<16x64xf32>
    %176 = arith.mulf %175, %174 : vector<16x64xf32>
    %177 = math.tanh %176 : vector<16x64xf32>
    %cst_72 = arith.constant 1.000000e+00 : f32
    %178 = vector.broadcast %cst_72 : f32 to vector<16x64xf32>
    %179 = arith.addf %178, %177 : vector<16x64xf32>
    %cst_73 = arith.constant 5.000000e-01 : f32
    %180 = vector.broadcast %cst_73 : f32 to vector<16x64xf32>
    %181 = arith.mulf %180, %179 : vector<16x64xf32>
    %182 = arith.mulf %169, %181 : vector<16x64xf32>
    %183 = arith.truncf %182 : vector<16x64xf32> to vector<16x64xbf16>
    %c0_74 = arith.constant 0 : index
    %c0_75 = arith.constant 0 : index
    %c0_76 = arith.constant 0 : index
    %184 = vector.load %arg14[%c0_74, %c0_75, %c0_76] : memref<2x64x32xbf16, #tpu.memory_space<vmem>>, vector<1x64x32xbf16>
    %185 = vector.shape_cast %184 : vector<1x64x32xbf16> to vector<64x32xbf16>
    %cst_77 = arith.constant dense<0.000000e+00> : vector<16x32xf32>
    %186 = tpu.matmul %183, %185, %cst_77 {dimension_numbers = #tpu.dot_dimension_numbers<[1], [0], [0], [1], [0, 0, 1, 1], [], []>} : vector<16x64xbf16>, vector<64x32xbf16>, vector<16x32xf32> -> vector<16x32xf32>
    %c0_78 = arith.constant 0 : index
    %c0_79 = arith.constant 0 : index
    %c0_80 = arith.constant 0 : index
    %187 = vector.load %arg15[%c0_78, %c0_79, %c0_80] : memref<2x1x32xf32, #tpu.memory_space<vmem>>, vector<1x1x32xf32>
    %188 = vector.shape_cast %187 : vector<1x1x32xf32> to vector<1x32xf32>
    %189 = vector.broadcast %188 : vector<1x32xf32> to vector<16x32xf32>
    %190 = arith.addf %186, %189 : vector<16x32xf32>
    %191 = arith.addf %161, %190 : vector<16x32xf32>
    %c0_81 = arith.constant 0 : index
    %c0_82 = arith.constant 0 : index
    %c0_83 = arith.constant 0 : index
    %192 = vector.load %arg16[%c0_81, %c0_82, %c0_83] : memref<2x1x32xf32, #tpu.memory_space<vmem>>, vector<1x1x32xf32>
    %193 = vector.shape_cast %192 : vector<1x1x32xf32> to vector<1x32xf32>
    %c0_84 = arith.constant 0 : index
    %c0_85 = arith.constant 0 : index
    %c0_86 = arith.constant 0 : index
    %194 = vector.load %arg17[%c0_84, %c0_85, %c0_86] : memref<2x1x32xf32, #tpu.memory_space<vmem>>, vector<1x1x32xf32>
    %195 = vector.shape_cast %194 : vector<1x1x32xf32> to vector<1x32xf32>
    %cst_87 = arith.constant dense<0.000000e+00> : vector<16xf32>
    %196 = vector.multi_reduction <add>, %191, %cst_87 [1] : vector<16x32xf32> to vector<16xf32>
    %197 = vector.shape_cast %196 : vector<16xf32> to vector<16x1xf32>
    %cst_88 = arith.constant 3.200000e+01 : f32
    %198 = vector.broadcast %cst_88 : f32 to vector<16x1xf32>
    %199 = arith.divf %197, %198 : vector<16x1xf32>
    %200 = vector.broadcast %199 : vector<16x1xf32> to vector<16x32xf32>
    %201 = arith.subf %191, %200 : vector<16x32xf32>
    %202 = arith.mulf %201, %201 : vector<16x32xf32>
    %cst_89 = arith.constant dense<0.000000e+00> : vector<16xf32>
    %203 = vector.multi_reduction <add>, %202, %cst_89 [1] : vector<16x32xf32> to vector<16xf32>
    %204 = vector.shape_cast %203 : vector<16xf32> to vector<16x1xf32>
    %cst_90 = arith.constant 3.200000e+01 : f32
    %205 = vector.broadcast %cst_90 : f32 to vector<16x1xf32>
    %206 = arith.divf %204, %205 : vector<16x1xf32>
    %207 = vector.broadcast %199 : vector<16x1xf32> to vector<16x32xf32>
    %208 = arith.subf %191, %207 : vector<16x32xf32>
    %cst_91 = arith.constant 9.99999996E-13 : f32
    %209 = vector.broadcast %cst_91 : f32 to vector<16x1xf32>
    %210 = arith.addf %206, %209 : vector<16x1xf32>
    %211 = math.rsqrt %210 : vector<16x1xf32>
    %212 = vector.broadcast %211 : vector<16x1xf32> to vector<16x32xf32>
    %213 = arith.mulf %208, %212 : vector<16x32xf32>
    %214 = vector.broadcast %193 : vector<1x32xf32> to vector<16x32xf32>
    %215 = arith.mulf %213, %214 : vector<16x32xf32>
    %216 = vector.broadcast %195 : vector<1x32xf32> to vector<16x32xf32>
    %217 = arith.addf %215, %216 : vector<16x32xf32>
    %218 = arith.truncf %217 : vector<16x32xf32> to vector<16x32xbf16>
    %c1_92 = arith.constant 1 : index
    %c0_93 = arith.constant 0 : index
    %c0_94 = arith.constant 0 : index
    %219 = vector.load %arg6[%c1_92, %c0_93, %c0_94] : memref<2x32x96xbf16, #tpu.memory_space<vmem>>, vector<1x32x96xbf16>
    %220 = vector.shape_cast %219 : vector<1x32x96xbf16> to vector<32x96xbf16>
    %cst_95 = arith.constant dense<0.000000e+00> : vector<16x96xf32>
    %221 = tpu.matmul %218, %220, %cst_95 {dimension_numbers = #tpu.dot_dimension_numbers<[1], [0], [0], [1], [0, 0, 1, 1], [], []>} : vector<16x32xbf16>, vector<32x96xbf16>, vector<16x96xf32> -> vector<16x96xf32>
    %c1_96 = arith.constant 1 : index
    %c0_97 = arith.constant 0 : index
    %c0_98 = arith.constant 0 : index
    %222 = vector.load %arg7[%c1_96, %c0_97, %c0_98] : memref<2x1x96xf32, #tpu.memory_space<vmem>>, vector<1x1x96xf32>
    %223 = vector.shape_cast %222 : vector<1x1x96xf32> to vector<1x96xf32>
    %224 = vector.broadcast %223 : vector<1x96xf32> to vector<16x96xf32>
    %225 = arith.addf %221, %224 : vector<16x96xf32>
    %226 = vector.extract_strided_slice %225 {offsets = [0, 0], sizes = [16, 32], strides = [1, 1]} : vector<16x96xf32> to vector<16x32xf32>
    %227 = vector.extract_strided_slice %225 {offsets = [0, 32], sizes = [16, 32], strides = [1, 1]} : vector<16x96xf32> to vector<16x32xf32>
    %228 = vector.extract_strided_slice %225 {offsets = [0, 64], sizes = [16, 32], strides = [1, 1]} : vector<16x96xf32> to vector<16x32xf32>
    %c0_99 = arith.constant 0 : index
    %c0_100 = arith.constant 0 : index
    %c0_101 = arith.constant 0 : index
    %229 = vector.load %arg3[%c0_99, %c0_100, %c0_101] : memref<2x1x8xf32, #tpu.memory_space<vmem>>, vector<1x1x8xf32>
    %230 = vector.shape_cast %229 : vector<1x1x8xf32> to vector<1x8xf32>
    %231 = vector.extract_strided_slice %226 {offsets = [0, 0], sizes = [8, 16], strides = [1, 1]} : vector<16x32xf32> to vector<8x16xf32>
    %232 = vector.extract_strided_slice %227 {offsets = [0, 0], sizes = [8, 16], strides = [1, 1]} : vector<16x32xf32> to vector<8x16xf32>
    %233 = vector.extract_strided_slice %228 {offsets = [0, 0], sizes = [8, 16], strides = [1, 1]} : vector<16x32xf32> to vector<8x16xf32>
    %234 = tpu.transpose %232, [1, 0] : vector<8x16xf32> -> vector<16x8xf32>
    %cst_102 = arith.constant dense<0.000000e+00> : vector<8x8xf32>
    %235 = tpu.matmul %231, %234, %cst_102 {dimension_numbers = #tpu.dot_dimension_numbers<[1], [0], [0], [1], [0, 0, 1, 1], [], []>} : vector<8x16xf32>, vector<16x8xf32>, vector<8x8xf32> -> vector<8x8xf32>
    %cst_103 = arith.constant 2.500000e-01 : f32
    %236 = vector.broadcast %cst_103 : f32 to vector<8x8xf32>
    %237 = arith.mulf %235, %236 : vector<8x8xf32>
    %238 = vector.broadcast %230 : vector<1x8xf32> to vector<8x8xf32>
    %239 = arith.addf %237, %238 : vector<8x8xf32>
    %cst_104 = arith.constant dense<0xFF800000> : vector<8xf32>
    %240 = vector.multi_reduction <maximumf>, %239, %cst_104 [1] : vector<8x8xf32> to vector<8xf32>
    %241 = vector.shape_cast %240 : vector<8xf32> to vector<8x1xf32>
    %242 = vector.broadcast %241 : vector<8x1xf32> to vector<8x8xf32>
    %243 = arith.subf %239, %242 : vector<8x8xf32>
    %244 = math.exp %243 : vector<8x8xf32>
    %cst_105 = arith.constant dense<0.000000e+00> : vector<8xf32>
    %245 = vector.multi_reduction <add>, %244, %cst_105 [1] : vector<8x8xf32> to vector<8xf32>
    %246 = vector.shape_cast %245 : vector<8xf32> to vector<8x1xf32>
    %247 = tpu.reciprocal %246 {approx = true} : vector<8x1xf32> -> vector<8x1xf32>
    %248 = vector.broadcast %247 : vector<8x1xf32> to vector<8x8xf32>
    %249 = arith.mulf %244, %248 : vector<8x8xf32>
    %cst_106 = arith.constant dense<0.000000e+00> : vector<8x16xf32>
    %250 = tpu.matmul %249, %233, %cst_106 {dimension_numbers = #tpu.dot_dimension_numbers<[1], [0], [0], [1], [0, 0, 1, 1], [], []>} : vector<8x8xf32>, vector<8x16xf32>, vector<8x16xf32> -> vector<8x16xf32>
    %251 = vector.extract_strided_slice %226 {offsets = [0, 16], sizes = [8, 16], strides = [1, 1]} : vector<16x32xf32> to vector<8x16xf32>
    %252 = vector.extract_strided_slice %227 {offsets = [0, 16], sizes = [8, 16], strides = [1, 1]} : vector<16x32xf32> to vector<8x16xf32>
    %253 = vector.extract_strided_slice %228 {offsets = [0, 16], sizes = [8, 16], strides = [1, 1]} : vector<16x32xf32> to vector<8x16xf32>
    %254 = tpu.transpose %252, [1, 0] : vector<8x16xf32> -> vector<16x8xf32>
    %cst_107 = arith.constant dense<0.000000e+00> : vector<8x8xf32>
    %255 = tpu.matmul %251, %254, %cst_107 {dimension_numbers = #tpu.dot_dimension_numbers<[1], [0], [0], [1], [0, 0, 1, 1], [], []>} : vector<8x16xf32>, vector<16x8xf32>, vector<8x8xf32> -> vector<8x8xf32>
    %cst_108 = arith.constant 2.500000e-01 : f32
    %256 = vector.broadcast %cst_108 : f32 to vector<8x8xf32>
    %257 = arith.mulf %255, %256 : vector<8x8xf32>
    %258 = vector.broadcast %230 : vector<1x8xf32> to vector<8x8xf32>
    %259 = arith.addf %257, %258 : vector<8x8xf32>
    %cst_109 = arith.constant dense<0xFF800000> : vector<8xf32>
    %260 = vector.multi_reduction <maximumf>, %259, %cst_109 [1] : vector<8x8xf32> to vector<8xf32>
    %261 = vector.shape_cast %260 : vector<8xf32> to vector<8x1xf32>
    %262 = vector.broadcast %261 : vector<8x1xf32> to vector<8x8xf32>
    %263 = arith.subf %259, %262 : vector<8x8xf32>
    %264 = math.exp %263 : vector<8x8xf32>
    %cst_110 = arith.constant dense<0.000000e+00> : vector<8xf32>
    %265 = vector.multi_reduction <add>, %264, %cst_110 [1] : vector<8x8xf32> to vector<8xf32>
    %266 = vector.shape_cast %265 : vector<8xf32> to vector<8x1xf32>
    %267 = tpu.reciprocal %266 {approx = true} : vector<8x1xf32> -> vector<8x1xf32>
    %268 = vector.broadcast %267 : vector<8x1xf32> to vector<8x8xf32>
    %269 = arith.mulf %264, %268 : vector<8x8xf32>
    %cst_111 = arith.constant dense<0.000000e+00> : vector<8x16xf32>
    %270 = tpu.matmul %269, %253, %cst_111 {dimension_numbers = #tpu.dot_dimension_numbers<[1], [0], [0], [1], [0, 0, 1, 1], [], []>} : vector<8x8xf32>, vector<8x16xf32>, vector<8x16xf32> -> vector<8x16xf32>
    %271 = tpu.concatenate %250, %270 in 1 : vector<8x16xf32>, vector<8x16xf32> -> vector<8x32xf32>
    %c1_112 = arith.constant 1 : index
    %c0_113 = arith.constant 0 : index
    %c0_114 = arith.constant 0 : index
    %272 = vector.load %arg3[%c1_112, %c0_113, %c0_114] : memref<2x1x8xf32, #tpu.memory_space<vmem>>, vector<1x1x8xf32>
    %273 = vector.shape_cast %272 : vector<1x1x8xf32> to vector<1x8xf32>
    %274 = vector.extract_strided_slice %226 {offsets = [8, 0], sizes = [8, 16], strides = [1, 1]} : vector<16x32xf32> to vector<8x16xf32>
    %275 = vector.extract_strided_slice %227 {offsets = [8, 0], sizes = [8, 16], strides = [1, 1]} : vector<16x32xf32> to vector<8x16xf32>
    %276 = vector.extract_strided_slice %228 {offsets = [8, 0], sizes = [8, 16], strides = [1, 1]} : vector<16x32xf32> to vector<8x16xf32>
    %277 = tpu.transpose %275, [1, 0] : vector<8x16xf32> -> vector<16x8xf32>
    %cst_115 = arith.constant dense<0.000000e+00> : vector<8x8xf32>
    %278 = tpu.matmul %274, %277, %cst_115 {dimension_numbers = #tpu.dot_dimension_numbers<[1], [0], [0], [1], [0, 0, 1, 1], [], []>} : vector<8x16xf32>, vector<16x8xf32>, vector<8x8xf32> -> vector<8x8xf32>
    %cst_116 = arith.constant 2.500000e-01 : f32
    %279 = vector.broadcast %cst_116 : f32 to vector<8x8xf32>
    %280 = arith.mulf %278, %279 : vector<8x8xf32>
    %281 = vector.broadcast %273 : vector<1x8xf32> to vector<8x8xf32>
    %282 = arith.addf %280, %281 : vector<8x8xf32>
    %cst_117 = arith.constant dense<0xFF800000> : vector<8xf32>
    %283 = vector.multi_reduction <maximumf>, %282, %cst_117 [1] : vector<8x8xf32> to vector<8xf32>
    %284 = vector.shape_cast %283 : vector<8xf32> to vector<8x1xf32>
    %285 = vector.broadcast %284 : vector<8x1xf32> to vector<8x8xf32>
    %286 = arith.subf %282, %285 : vector<8x8xf32>
    %287 = math.exp %286 : vector<8x8xf32>
    %cst_118 = arith.constant dense<0.000000e+00> : vector<8xf32>
    %288 = vector.multi_reduction <add>, %287, %cst_118 [1] : vector<8x8xf32> to vector<8xf32>
    %289 = vector.shape_cast %288 : vector<8xf32> to vector<8x1xf32>
    %290 = tpu.reciprocal %289 {approx = true} : vector<8x1xf32> -> vector<8x1xf32>
    %291 = vector.broadcast %290 : vector<8x1xf32> to vector<8x8xf32>
    %292 = arith.mulf %287, %291 : vector<8x8xf32>
    %cst_119 = arith.constant dense<0.000000e+00> : vector<8x16xf32>
    %293 = tpu.matmul %292, %276, %cst_119 {dimension_numbers = #tpu.dot_dimension_numbers<[1], [0], [0], [1], [0, 0, 1, 1], [], []>} : vector<8x8xf32>, vector<8x16xf32>, vector<8x16xf32> -> vector<8x16xf32>
    %294 = vector.extract_strided_slice %226 {offsets = [8, 16], sizes = [8, 16], strides = [1, 1]} : vector<16x32xf32> to vector<8x16xf32>
    %295 = vector.extract_strided_slice %227 {offsets = [8, 16], sizes = [8, 16], strides = [1, 1]} : vector<16x32xf32> to vector<8x16xf32>
    %296 = vector.extract_strided_slice %228 {offsets = [8, 16], sizes = [8, 16], strides = [1, 1]} : vector<16x32xf32> to vector<8x16xf32>
    %297 = tpu.transpose %295, [1, 0] : vector<8x16xf32> -> vector<16x8xf32>
    %cst_120 = arith.constant dense<0.000000e+00> : vector<8x8xf32>
    %298 = tpu.matmul %294, %297, %cst_120 {dimension_numbers = #tpu.dot_dimension_numbers<[1], [0], [0], [1], [0, 0, 1, 1], [], []>} : vector<8x16xf32>, vector<16x8xf32>, vector<8x8xf32> -> vector<8x8xf32>
    %cst_121 = arith.constant 2.500000e-01 : f32
    %299 = vector.broadcast %cst_121 : f32 to vector<8x8xf32>
    %300 = arith.mulf %298, %299 : vector<8x8xf32>
    %301 = vector.broadcast %273 : vector<1x8xf32> to vector<8x8xf32>
    %302 = arith.addf %300, %301 : vector<8x8xf32>
    %cst_122 = arith.constant dense<0xFF800000> : vector<8xf32>
    %303 = vector.multi_reduction <maximumf>, %302, %cst_122 [1] : vector<8x8xf32> to vector<8xf32>
    %304 = vector.shape_cast %303 : vector<8xf32> to vector<8x1xf32>
    %305 = vector.broadcast %304 : vector<8x1xf32> to vector<8x8xf32>
    %306 = arith.subf %302, %305 : vector<8x8xf32>
    %307 = math.exp %306 : vector<8x8xf32>
    %cst_123 = arith.constant dense<0.000000e+00> : vector<8xf32>
    %308 = vector.multi_reduction <add>, %307, %cst_123 [1] : vector<8x8xf32> to vector<8xf32>
    %309 = vector.shape_cast %308 : vector<8xf32> to vector<8x1xf32>
    %310 = tpu.reciprocal %309 {approx = true} : vector<8x1xf32> -> vector<8x1xf32>
    %311 = vector.broadcast %310 : vector<8x1xf32> to vector<8x8xf32>
    %312 = arith.mulf %307, %311 : vector<8x8xf32>
    %cst_124 = arith.constant dense<0.000000e+00> : vector<8x16xf32>
    %313 = tpu.matmul %312, %296, %cst_124 {dimension_numbers = #tpu.dot_dimension_numbers<[1], [0], [0], [1], [0, 0, 1, 1], [], []>} : vector<8x8xf32>, vector<8x16xf32>, vector<8x16xf32> -> vector<8x16xf32>
    %314 = tpu.concatenate %293, %313 in 1 : vector<8x16xf32>, vector<8x16xf32> -> vector<8x32xf32>
    %315 = tpu.concatenate %271, %314 in 0 : vector<8x32xf32>, vector<8x32xf32> -> vector<16x32xf32>
    %316 = arith.truncf %315 : vector<16x32xf32> to vector<16x32xbf16>
    %c1_125 = arith.constant 1 : index
    %c0_126 = arith.constant 0 : index
    %c0_127 = arith.constant 0 : index
    %317 = vector.load %arg8[%c1_125, %c0_126, %c0_127] : memref<2x32x32xbf16, #tpu.memory_space<vmem>>, vector<1x32x32xbf16>
    %318 = vector.shape_cast %317 : vector<1x32x32xbf16> to vector<32x32xbf16>
    %cst_128 = arith.constant dense<0.000000e+00> : vector<16x32xf32>
    %319 = tpu.matmul %316, %318, %cst_128 {dimension_numbers = #tpu.dot_dimension_numbers<[1], [0], [0], [1], [0, 0, 1, 1], [], []>} : vector<16x32xbf16>, vector<32x32xbf16>, vector<16x32xf32> -> vector<16x32xf32>
    %c1_129 = arith.constant 1 : index
    %c0_130 = arith.constant 0 : index
    %c0_131 = arith.constant 0 : index
    %320 = vector.load %arg9[%c1_129, %c0_130, %c0_131] : memref<2x1x32xf32, #tpu.memory_space<vmem>>, vector<1x1x32xf32>
    %321 = vector.shape_cast %320 : vector<1x1x32xf32> to vector<1x32xf32>
    %322 = vector.broadcast %321 : vector<1x32xf32> to vector<16x32xf32>
    %323 = arith.addf %319, %322 : vector<16x32xf32>
    %324 = arith.addf %217, %323 : vector<16x32xf32>
    %c1_132 = arith.constant 1 : index
    %c0_133 = arith.constant 0 : index
    %c0_134 = arith.constant 0 : index
    %325 = vector.load %arg10[%c1_132, %c0_133, %c0_134] : memref<2x1x32xf32, #tpu.memory_space<vmem>>, vector<1x1x32xf32>
    %326 = vector.shape_cast %325 : vector<1x1x32xf32> to vector<1x32xf32>
    %c1_135 = arith.constant 1 : index
    %c0_136 = arith.constant 0 : index
    %c0_137 = arith.constant 0 : index
    %327 = vector.load %arg11[%c1_135, %c0_136, %c0_137] : memref<2x1x32xf32, #tpu.memory_space<vmem>>, vector<1x1x32xf32>
    %328 = vector.shape_cast %327 : vector<1x1x32xf32> to vector<1x32xf32>
    %cst_138 = arith.constant dense<0.000000e+00> : vector<16xf32>
    %329 = vector.multi_reduction <add>, %324, %cst_138 [1] : vector<16x32xf32> to vector<16xf32>
    %330 = vector.shape_cast %329 : vector<16xf32> to vector<16x1xf32>
    %cst_139 = arith.constant 3.200000e+01 : f32
    %331 = vector.broadcast %cst_139 : f32 to vector<16x1xf32>
    %332 = arith.divf %330, %331 : vector<16x1xf32>
    %333 = vector.broadcast %332 : vector<16x1xf32> to vector<16x32xf32>
    %334 = arith.subf %324, %333 : vector<16x32xf32>
    %335 = arith.mulf %334, %334 : vector<16x32xf32>
    %cst_140 = arith.constant dense<0.000000e+00> : vector<16xf32>
    %336 = vector.multi_reduction <add>, %335, %cst_140 [1] : vector<16x32xf32> to vector<16xf32>
    %337 = vector.shape_cast %336 : vector<16xf32> to vector<16x1xf32>
    %cst_141 = arith.constant 3.200000e+01 : f32
    %338 = vector.broadcast %cst_141 : f32 to vector<16x1xf32>
    %339 = arith.divf %337, %338 : vector<16x1xf32>
    %340 = vector.broadcast %332 : vector<16x1xf32> to vector<16x32xf32>
    %341 = arith.subf %324, %340 : vector<16x32xf32>
    %cst_142 = arith.constant 9.99999996E-13 : f32
    %342 = vector.broadcast %cst_142 : f32 to vector<16x1xf32>
    %343 = arith.addf %339, %342 : vector<16x1xf32>
    %344 = math.rsqrt %343 : vector<16x1xf32>
    %345 = vector.broadcast %344 : vector<16x1xf32> to vector<16x32xf32>
    %346 = arith.mulf %341, %345 : vector<16x32xf32>
    %347 = vector.broadcast %326 : vector<1x32xf32> to vector<16x32xf32>
    %348 = arith.mulf %346, %347 : vector<16x32xf32>
    %349 = vector.broadcast %328 : vector<1x32xf32> to vector<16x32xf32>
    %350 = arith.addf %348, %349 : vector<16x32xf32>
    %351 = arith.truncf %350 : vector<16x32xf32> to vector<16x32xbf16>
    %c1_143 = arith.constant 1 : index
    %c0_144 = arith.constant 0 : index
    %c0_145 = arith.constant 0 : index
    %352 = vector.load %arg12[%c1_143, %c0_144, %c0_145] : memref<2x32x64xbf16, #tpu.memory_space<vmem>>, vector<1x32x64xbf16>
    %353 = vector.shape_cast %352 : vector<1x32x64xbf16> to vector<32x64xbf16>
    %cst_146 = arith.constant dense<0.000000e+00> : vector<16x64xf32>
    %354 = tpu.matmul %351, %353, %cst_146 {dimension_numbers = #tpu.dot_dimension_numbers<[1], [0], [0], [1], [0, 0, 1, 1], [], []>} : vector<16x32xbf16>, vector<32x64xbf16>, vector<16x64xf32> -> vector<16x64xf32>
    %c1_147 = arith.constant 1 : index
    %c0_148 = arith.constant 0 : index
    %c0_149 = arith.constant 0 : index
    %355 = vector.load %arg13[%c1_147, %c0_148, %c0_149] : memref<2x1x64xf32, #tpu.memory_space<vmem>>, vector<1x1x64xf32>
    %356 = vector.shape_cast %355 : vector<1x1x64xf32> to vector<1x64xf32>
    %357 = vector.broadcast %356 : vector<1x64xf32> to vector<16x64xf32>
    %358 = arith.addf %354, %357 : vector<16x64xf32>
    %359 = arith.mulf %358, %358 : vector<16x64xf32>
    %360 = arith.mulf %358, %359 : vector<16x64xf32>
    %cst_150 = arith.constant 4.471500e-02 : f32
    %361 = vector.broadcast %cst_150 : f32 to vector<16x64xf32>
    %362 = arith.mulf %361, %360 : vector<16x64xf32>
    %363 = arith.addf %358, %362 : vector<16x64xf32>
    %cst_151 = arith.constant 0.797884583 : f32
    %364 = vector.broadcast %cst_151 : f32 to vector<16x64xf32>
    %365 = arith.mulf %364, %363 : vector<16x64xf32>
    %366 = math.tanh %365 : vector<16x64xf32>
    %cst_152 = arith.constant 1.000000e+00 : f32
    %367 = vector.broadcast %cst_152 : f32 to vector<16x64xf32>
    %368 = arith.addf %367, %366 : vector<16x64xf32>
    %cst_153 = arith.constant 5.000000e-01 : f32
    %369 = vector.broadcast %cst_153 : f32 to vector<16x64xf32>
    %370 = arith.mulf %369, %368 : vector<16x64xf32>
    %371 = arith.mulf %358, %370 : vector<16x64xf32>
    %372 = arith.truncf %371 : vector<16x64xf32> to vector<16x64xbf16>
    %c1_154 = arith.constant 1 : index
    %c0_155 = arith.constant 0 : index
    %c0_156 = arith.constant 0 : index
    %373 = vector.load %arg14[%c1_154, %c0_155, %c0_156] : memref<2x64x32xbf16, #tpu.memory_space<vmem>>, vector<1x64x32xbf16>
    %374 = vector.shape_cast %373 : vector<1x64x32xbf16> to vector<64x32xbf16>
    %cst_157 = arith.constant dense<0.000000e+00> : vector<16x32xf32>
    %375 = tpu.matmul %372, %374, %cst_157 {dimension_numbers = #tpu.dot_dimension_numbers<[1], [0], [0], [1], [0, 0, 1, 1], [], []>} : vector<16x64xbf16>, vector<64x32xbf16>, vector<16x32xf32> -> vector<16x32xf32>
    %c1_158 = arith.constant 1 : index
    %c0_159 = arith.constant 0 : index
    %c0_160 = arith.constant 0 : index
    %376 = vector.load %arg15[%c1_158, %c0_159, %c0_160] : memref<2x1x32xf32, #tpu.memory_space<vmem>>, vector<1x1x32xf32>
    %377 = vector.shape_cast %376 : vector<1x1x32xf32> to vector<1x32xf32>
    %378 = vector.broadcast %377 : vector<1x32xf32> to vector<16x32xf32>
    %379 = arith.addf %375, %378 : vector<16x32xf32>
    %380 = arith.addf %350, %379 : vector<16x32xf32>
    %c1_161 = arith.constant 1 : index
    %c0_162 = arith.constant 0 : index
    %c0_163 = arith.constant 0 : index
    %381 = vector.load %arg16[%c1_161, %c0_162, %c0_163] : memref<2x1x32xf32, #tpu.memory_space<vmem>>, vector<1x1x32xf32>
    %382 = vector.shape_cast %381 : vector<1x1x32xf32> to vector<1x32xf32>
    %c1_164 = arith.constant 1 : index
    %c0_165 = arith.constant 0 : index
    %c0_166 = arith.constant 0 : index
    %383 = vector.load %arg17[%c1_164, %c0_165, %c0_166] : memref<2x1x32xf32, #tpu.memory_space<vmem>>, vector<1x1x32xf32>
    %384 = vector.shape_cast %383 : vector<1x1x32xf32> to vector<1x32xf32>
    %cst_167 = arith.constant dense<0.000000e+00> : vector<16xf32>
    %385 = vector.multi_reduction <add>, %380, %cst_167 [1] : vector<16x32xf32> to vector<16xf32>
    %386 = vector.shape_cast %385 : vector<16xf32> to vector<16x1xf32>
    %cst_168 = arith.constant 3.200000e+01 : f32
    %387 = vector.broadcast %cst_168 : f32 to vector<16x1xf32>
    %388 = arith.divf %386, %387 : vector<16x1xf32>
    %389 = vector.broadcast %388 : vector<16x1xf32> to vector<16x32xf32>
    %390 = arith.subf %380, %389 : vector<16x32xf32>
    %391 = arith.mulf %390, %390 : vector<16x32xf32>
    %cst_169 = arith.constant dense<0.000000e+00> : vector<16xf32>
    %392 = vector.multi_reduction <add>, %391, %cst_169 [1] : vector<16x32xf32> to vector<16xf32>
    %393 = vector.shape_cast %392 : vector<16xf32> to vector<16x1xf32>
    %cst_170 = arith.constant 3.200000e+01 : f32
    %394 = vector.broadcast %cst_170 : f32 to vector<16x1xf32>
    %395 = arith.divf %393, %394 : vector<16x1xf32>
    %396 = vector.broadcast %388 : vector<16x1xf32> to vector<16x32xf32>
    %397 = arith.subf %380, %396 : vector<16x32xf32>
    %cst_171 = arith.constant 9.99999996E-13 : f32
    %398 = vector.broadcast %cst_171 : f32 to vector<16x1xf32>
    %399 = arith.addf %395, %398 : vector<16x1xf32>
    %400 = math.rsqrt %399 : vector<16x1xf32>
    %401 = vector.broadcast %400 : vector<16x1xf32> to vector<16x32xf32>
    %402 = arith.mulf %397, %401 : vector<16x32xf32>
    %403 = vector.broadcast %382 : vector<1x32xf32> to vector<16x32xf32>
    %404 = arith.mulf %402, %403 : vector<16x32xf32>
    %405 = vector.broadcast %384 : vector<1x32xf32> to vector<16x32xf32>
    %406 = arith.addf %404, %405 : vector<16x32xf32>
    %c0_172 = arith.constant 0 : index
    %c0_173 = arith.constant 0 : index
    %407 = vector.load %arg18[%c0_172, %c0_173] : memref<16x32xf32, #tpu.memory_space<vmem>>, vector<16x32xf32>
    tpu.vector_store %arg18[%c0_172, %c0_173], %406 {strides = array<i32>} : memref<16x32xf32, #tpu.memory_space<vmem>>, vector<16x32xf32>,
    return
  }
}

</mosaic_0001>

<bundles_post_ra>
// kernel: base_encoder_forward.1
= control target key start
LH: loop header
LB: loop body
LE: loop exit
PB: predicated region body
PF: predicated region fallthrough
CT: control target
= control target key end

     0   :  { %s3250_s0 = inlined_call_operand.vmem [shape: f32[16,32], index: 0, kind: input, shape index: {}]   ;;  %s3251_s1 = inlined_call_operand.vmem [shape: f32[16,32], index: 1, kind: input, shape index: {}]   ;;  %s3252_s2 = inlined_call_operand.vmem [shape: f32[16,32], index: 2, kind: input, shape index: {}]   ;;  %s3253_s3 = inlined_call_operand.vmem [shape: f32[2,1,8], index: 3, kind: input, shape index: {}]   ;;  %s3254_s4 = inlined_call_operand.vmem [shape: f32[1,32], index: 4, kind: input, shape index: {}]   ;;  %s3255_s5 = inlined_call_operand.vmem [shape: f32[1,32], index: 5, kind: input, shape index: {}]   ;;  %s3256_s6 = inlined_call_operand.vmem [shape: bf16[2,32,96], index: 6, kind: input, shape index: {}]   ;;  %s3257_s7 = inlined_call_operand.vmem [shape: f32[2,1,96], index: 7, kind: input, shape index: {}]   ;;  %s3258_s8 = inlined_call_operand.vmem [shape: bf16[2,32,32], index: 8, kind: input, shape index: {}]   ;;  %s3259_s9 = inlined_call_operand.vmem [shape: f32[2,1,32], index: 9, kind: input, shape index: {}]   ;;  %s3260_s10 = inlined_call_operand.vmem [shape: f32[2,1,32], index: 10, kind: input, shape index: {}]   ;;  %s3261_s11 = inlined_call_operand.vmem [shape: f32[2,1,32], index: 11, kind: input, shape index: {}]   ;;  %s3262_s12 = inlined_call_operand.vmem [shape: bf16[2,32,64], index: 12, kind: input, shape index: {}]   ;;  %s3263_s13 = inlined_call_operand.vmem [shape: f32[2,1,64], index: 13, kind: input, shape index: {}]   ;;  %s3264_s14 = inlined_call_operand.vmem [shape: bf16[2,64,32], index: 14, kind: input, shape index: {}]   ;;  %s3265_s15 = inlined_call_operand.vmem [shape: f32[2,1,32], index: 15, kind: input, shape index: {}]   ;;  %s3266_s16 = inlined_call_operand.vmem [shape: f32[2,1,32], index: 16, kind: input, shape index: {}]   ;;  %s3267_s17 = inlined_call_operand.vmem [shape: f32[2,1,32], index: 17, kind: input, shape index: {}]   ;;  %s3268_s18 = inlined_call_operand.hbm [shape: f32[16,32], index: 18, kind: output, shape index: {}]  }
   0x1   :  { %3273 = sst [smem:[#allocation5_spill]] %s3250_s0 }
   0x2   :  { %3274 = sst [smem:[#allocation6_spill]] %s3251_s1 }
   0x3   :  { %3275 = sst [smem:[#allocation7_spill]] %s3252_s2 }
   0x4   :  { %3276 = sst [smem:[#allocation8_spill]] %s3263_s13 }
   0x5   :  { %s3277_s29 = sld [smem:[#allocation5_spill]]  ;;  %s3278_s13 = sld [smem:[#allocation6_spill]]  ;;  %vm73_vm0 = vcmask 261120  }
   0x6   :  { %s3279_s20 = sld [smem:[#allocation7_spill]] }
   0xb   :  { %v61_v0 = vld [vmem:[%s3277_s29] sm:$0xff]  ;;  %v62_v4 = vld [vmem:[%s3277_s29 + $0x8] sm:$0xff] }
   0xc   :  { %v63_v1 = vld [vmem:[%s3278_s13] sm:$0xff]  ;;  %v64_v5 = vld [vmem:[%s3278_s13 + $0x8] sm:$0xff] }
   0xd   :  { %v67_v2 = vld [vmem:[%s3279_s20] sm:$0xff]  ;;  %v65_v3 = vadd.f32 %v63_v1, %v61_v0  ;;  %v68_v6 = vld [vmem:[%s3279_s20 + $0x8] sm:$0xff]  ;;  %v66_v7 = vadd.f32 %v64_v5, %v62_v4 }
   0xf   :  { %v69_v8 = vadd.f32 %v67_v2, %v65_v3  ;;  %v70_v9 = vadd.f32 %v68_v6, %v66_v7 }
  0x11   :  { %v74_v10 = vsel %vm73_vm0, %v69_v8, 0.0  ;;  %v77_v11 = vsel %vm73_vm0, %v70_v9, 0.0 }
  0x12   :  { %75 = vadd.xlane.f32.xlu0 %v74_v10 }
  0x16   :  { %78 = vadd.xlane.f32.xlu0 %v77_v11 }
  0x17   :  { %23 = vsyncpa [#allocation3], 0  ;;  %v2647_v22 = vld [vmem:[%s3256_s6] sm:$0xff]   ;;  %v2751_v23 = vmov 0.0   ;;  %v2648_v24 = vld [vmem:[%s3256_s6 + $0x8] sm:$0xff]   ;;  %vm2752_vm1 = vmmov 0  }
  0x18   :  { %2474 = vmatprep.subr.bf16.mxu0 %v2751_v23  ;;  %2487 = vmatprep.subr.mxu1 %v2751_v23  ;;  %v2313_v33 = vld [vmem:[%s3254_s4] ss:$0 sm:$0xff]  ;;  %s2754_s20 = smov 80   ;;  %s2755_s21 = smov 112   ;;  %vm189_vm2 = vcmask 130048   ;;  %vm272_vm3 = vcmask 64512  }
  0x19   :  { %2475 = vmatpush3.bf16.msra.mxu0 %v2647_v22  ;;  %2478 = vmatprep.mubr.msk.bf16.mxu0 %vm2752_vm1, %v2751_v23  ;;  %v2314_v37 = vld [vmem:[%s3255_s5] ss:$0 sm:$0xff]  ;;  %s2753_s5 = smov 96   ;;  %s2756_s23 = smov 64   ;;  %vm1118_vm4 = vcmask 523264  }
  0x1a   :  { %2476 = vmatprep.subr.bf16.mxu0 %v2751_v23  ;;  %2489 = vmatprep.mubr.msk.f32.mxu1 %vm2752_vm1, %v2751_v23  ;;  %v2315_v42 = vld [vmem:[%s3257_s7] ss:$0 sm:$0xff]  ;;  %s2758_s29 = smov 16   ;;  %s3280_s24 = sld [smem:[#allocation8_spill]] }
  0x1b   :  { %v2932_v51 = vld [vmem:[%s3253_s3] ss:$0 sm:$0xff] }
  0x1d   :  { %2477 = vmatpush3.bf16.msra.mxu0 %v2648_v24 }
  0x1e   :  { %2482 = vmatprep.subr.mxu0 %v2751_v23 }
  0x9f   :  { %v76_v12 = vpop.xlane.xlu0 %75 }
  0xa0   :  { %v81_v13 = vmul.f32 0.03125, %v76_v12 }
  0xa2   :  { %v83_v14 = vsub.f32 %v69_v8, %v81_v13  ;;  %v2969_v13 = vld [vmem:[%s3253_s3 + $0x1] ss:$0 sm:$0xff]  ;;  %s2757_s3 = smov 48  }
  0xa3   :  { %v79_v15 = vpop.xlane.xlu0 %78 }
  0xa4   :  { %v82_v16 = vmul.f32 0.03125, %v79_v15  ;;  %v85_v17 = vmul.f32 %v83_v14, %v83_v14 }
  0xa6   :  { %v84_v18 = vsub.f32 %v70_v9, %v82_v16  ;;  %v87_v19 = vsel %vm73_vm0, %v85_v17, 0.0 }
  0xa7   :  { %88 = vadd.xlane.f32.xlu1 %v87_v19 }
  0xa8   :  { %v86_v20 = vmul.f32 %v84_v18, %v84_v18 }
  0xaa   :  { %v90_v21 = vsel %vm73_vm0, %v86_v20, 0.0 }
  0xab   :  { %91 = vadd.xlane.f32.xlu1 %v90_v21 }
 0x134   :  { %v89_v25 = vpop.xlane.xlu1 %88 }
 0x135   :  { %v93_v26 = vmul.f32 0.03125, %v89_v25 }
 0x137   :  { %v95_v27 = vadd.f32 1e-12, %v93_v26 }
 0x138   :  { %v92_v28 = vpop.xlane.xlu1 %91 }
 0x139   :  { %2667 = vrsqrt.f32 %v95_v27  ;;  %v94_v29 = vmul.f32 0.03125, %v92_v28 }
 0x13b   :  { %v96_v30 = vadd.f32 1e-12, %v94_v29 }
 0x13d   :  { %2669 = vrsqrt.f32 %v96_v30 }
 0x143   :  { %v2668_v31 = vpop.eup %2667 }
 0x144   :  { %v99_v32 = vmul.f32 %v2668_v31, %v83_v14 }
 0x146   :  { %v107_v36 = vmul.f32 %v2313_v33, %v99_v32 }
 0x147   :  { %v2670_v34 = vpop.eup %2669 }
 0x148   :  { %v100_v35 = vmul.f32 %v2670_v34, %v84_v18  ;;  %v2899_v39 = vadd.f32 %v2314_v37, %v107_v36 }
 0x14a   :  { %v108_v38 = vmul.f32 %v2313_v33, %v100_v35 }
 0x14c   :  { %v2901_v40 = vadd.f32 %v2314_v37, %v108_v38 }
 0x14e   :  { %v117_v41 = vpack.c.bf16 %v2901_v40, %v2899_v39 }
 0x150   :  { %2479 = vmatmul.mubr.msk.bf16.vlgmr.msra.gmra.mrb[0].mxu0 %vm73_vm0, %v117_v41 }
 0x151   :  { %2484 = vmatprep.mubr.msk.f32.mxu0 %vm2752_vm1, %v2751_v23 }
 0x223   :  { %v178_v43 = vpop.f32.mrb[0].mxu0 }
 0x224   :  { %v2911_v44 = vadd.f32 %v2315_v42, %v178_v43  ;;  %v2480_v45 = vpop.f32.mrb[1].mxu0 }
 0x225   :  { %v181_v46 = vpop.f32.mrb[2].mxu0 }
 0x226   :  { %187 = vrot.lane.b32.xlu0 %v2911_v44, %s2753_s5  ;;  %v2481_v47 = vpop.f32.mrb[3].mxu0  ;;  %v2917_v48 = vadd.f32 %v2315_v42, %v181_v46 }
 0x22a   :  { %362 = vrot.lane.b32.xlu0 %v2911_v44, %s2754_s20 }
 0x22e   :  { %535 = vrot.lane.b32.xlu0 %v2917_v48, %s2753_s5 }
 0x232   :  { %706 = vrot.lane.b32.xlu0 %v2917_v48, %s2755_s21 }
 0x298   :  { %v188_v49 = vpop.permute.xlu0 %187 }
 0x299   :  { %2483 = vmatpush3.xpose.msk.msra.mxu0 %vm189_vm2, %v188_v49 }
 0x29a   :  { %2497 = vmatprep.subr.mxu0 %v2751_v23 }
 0x29c   :  { %2485 = vmatmul.mubr.msk.f32.vlgmr.msra.gmra.mrb[4].mxu0 %vm189_vm2, %v2911_v44  ;;  %v363_v1 = vpop.permute.xlu0 %362 }
 0x29d   :  { %2499 = vmatprep.mubr.msk.f32.mxu0 %vm2752_vm1, %v2751_v23 }
 0x2a0   :  { %v536_v3 = vpop.permute.xlu0 %535 }
 0x2a4   :  { %v707_v5 = vpop.permute.xlu0 %706 }
 0x36f   :  { %v260_v50 = vpop.f32.mrb[4].mxu0 }
 0x370   :  { %v264_v52 = vmul.f32 0.25, %v260_v50  ;;  %v2486_v53 = vpop.f32.mrb[5].mxu0 }
 0x372   :  { %v271_v54 = vadd.f32 %v2932_v51, %v264_v52 }
 0x374   :  { %v273_v55 = vsel %vm272_vm3, %v271_v54, -inf }
 0x375   :  { %274 = vmax.xlane.f32.xlu1 %v273_v55  ;;  %v2649_v55 = vld [vmem:[%s3258_s8] sm:$0xff]  }
 0x386   :  { %284 = vrot.lane.b32.xlu1 %v2911_v44, %s2756_s23 }
 0x38a   :  { %360 = vrot.lane.b32.xlu1 %v2911_v44, %s2755_s21 }
 0x402   :  { %v275_v56 = vpop.xlane.xlu1 %274 }
 0x403   :  { %v276_v57 = vsub.f32 %v271_v54, %v275_v56  ;;  %v2650_v56 = vld [vmem:[%s3258_s8 + $0x8] sm:$0xff]  }
 0x405   :  { %v277_v58 = vmul.f32 1.442695, %v276_v57 }
 0x406   :  { %v285_v59 = vpop.permute.xlu1 %284 }
 0x407   :  { %2671 = vpow2.f32 %v277_v58  ;;  %2488 = vmatpush3.msra.mxu1 %v285_v59 }
 0x408   :  { %2492 = vmatprep.subr.mxu1 %v2751_v23 }
 0x40a   :  { %v361_v62 = vpop.permute.xlu1 %360 }
 0x411   :  { %v2672_v60 = vpop.eup %2671 }
 0x412   :  { %v279_v61 = vsel %vm272_vm3, %v2672_v60, 0.0 }
 0x413   :  { %280 = vadd.xlane.f32.xlu1 %v279_v61 }
 0x424   :  { %708 = vrot.lane.b32.xlu1 %v2917_v48, %s2754_s20 }
 0x4a0   :  { %v281_v63 = vpop.xlane.xlu1 %280 }
 0x4a1   :  { %2673 = vrcp.f32 %v281_v63 }
 0x4a4   :  { %v709_v4 = vpop.permute.xlu1 %708 }
 0x4ab   :  { %v2674_v0 = vpop.eup %2673 }
 0x4ac   :  { %v283_v2 = vmul.f32 %v2674_v0, %v2672_v60 }
 0x4ae   :  { %2490 = vmatmul.mubr.msk.f32.vlgmr.msra.gmra.mrb[0].mxu1 %vm272_vm3, %v283_v2 }
 0x4af   :  { %2493 = vmatpush3.xpose.msk.msra.mxu1 %vm189_vm2, %v363_v1  ;;  %2494 = vmatprep.mubr.msk.f32.mxu1 %vm2752_vm1, %v2751_v23 }
 0x4b0   :  { %2502 = vmatprep.subr.mxu1 %v2751_v23 }
 0x4b2   :  { %2495 = vmatmul.mubr.msk.f32.vlgmr.msra.gmra.mrb[2].mxu1 %vm189_vm2, %v361_v62 }
 0x4b3   :  { %2503 = vmatpush3.xpose.msk.msra.mxu1 %vm189_vm2, %v536_v3  ;;  %2504 = vmatprep.mubr.msk.f32.mxu1 %vm2752_vm1, %v2751_v23 }
 0x4b4   :  { %2512 = vmatprep.subr.mxu1 %v2751_v23 }
 0x4b6   :  { %2505 = vmatmul.mubr.msk.f32.vlgmr.msra.gmra.mrb[4].mxu1 %vm189_vm2, %v2917_v48 }
 0x4b7   :  { %2513 = vmatpush3.xpose.msk.msra.mxu1 %vm189_vm2, %v709_v4  ;;  %2514 = vmatprep.mubr.msk.f32.mxu1 %vm2752_vm1, %v2751_v23 }
 0x4b8   :  { %2522 = vmatprep.subr.bf16.mxu1 %v2751_v23 }
 0x4ba   :  { %2515 = vmatmul.mubr.msk.f32.vlgmr.msra.gmra.mrb[6].mxu1 %vm189_vm2, %v707_v5 }
 0x4bb   :  { %2526 = vmatprep.mubr.msk.bf16.mxu1 %vm2752_vm1, %v2751_v23  ;;  %2523 = vmatpush3.bf16.msra.mxu1 %v2649_v55 }
 0x4bc   :  { %2524 = vmatprep.subr.bf16.mxu1 %v2751_v23 }
 0x4bf   :  { %2525 = vmatpush3.bf16.msra.mxu1 %v2650_v56 }
 0x4c0   :  { %2538 = vmatprep.subr.bf16.mxu1 %v2751_v23 }
 0x581   :  { %v2963_v6 = vpop.f32.mrb[0].mxu1 }
 0x582   :  { %v2491_v7 = vpop.f32.mrb[1].mxu1 }
 0x583   :  { %v2334_v7 = vld [vmem:[%s3259_s9] ss:$0 sm:$0xff] }
 0x585   :  { %v434_v8 = vpop.f32.mrb[2].mxu1 }
 0x586   :  { %v438_v9 = vmul.f32 0.25, %v434_v8  ;;  %v2496_v10 = vpop.f32.mrb[3].mxu1 }
 0x588   :  { %v439_v11 = vadd.f32 %v2932_v51, %v438_v9 }
 0x589   :  { %v607_v12 = vpop.f32.mrb[4].mxu1 }
 0x58a   :  { %v611_v14 = vmul.f32 0.25, %v607_v12  ;;  %v2506_v15 = vpop.f32.mrb[5].mxu1  ;;  %v440_v16 = vsel %vm272_vm3, %v439_v11, -inf }
 0x58b   :  { %441 = vmax.xlane.f32.xlu1 %v440_v16 }
 0x58c   :  { %v618_v17 = vadd.f32 %v2969_v13, %v611_v14 }
 0x58d   :  { %v780_v18 = vpop.f32.mrb[6].mxu1 }
 0x58e   :  { %v784_v19 = vmul.f32 0.25, %v780_v18  ;;  %v2516_v20 = vpop.f32.mrb[7].mxu1  ;;  %v619_v21 = vsel %vm272_vm3, %v618_v17, -inf }
 0x58f   :  { %620 = vmax.xlane.f32.xlu0 %v619_v21 }
 0x590   :  { %v785_v22 = vadd.f32 %v2969_v13, %v784_v19 }
 0x592   :  { %v786_v24 = vsel %vm272_vm3, %v785_v22, -inf }
 0x593   :  { %787 = vmax.xlane.f32.xlu0 %v786_v24 }
 0x59c   :  { %451 = vrot.lane.b32.xlu1 %v2911_v44, %s2757_s3 }
 0x618   :  { %v442_v25 = vpop.xlane.xlu1 %441 }
 0x619   :  { %v443_v26 = vsub.f32 %v439_v11, %v442_v25 }
 0x61b   :  { %v444_v27 = vmul.f32 1.442695, %v443_v26 }
 0x61c   :  { %v621_v28 = vpop.xlane.xlu0 %620  ;;  %v452_v29 = vpop.permute.xlu1 %451 }
 0x61d   :  { %2675 = vpow2.f32 %v444_v27  ;;  %v622_v30 = vsub.f32 %v618_v17, %v621_v28  ;;  %2498 = vmatpush3.msra.mxu0 %v452_v29  ;;  %v2652_v28 = vld [vmem:[%s3262_s12 + $0x8] sm:$0xff]  }
 0x61e   :  { %2507 = vmatprep.subr.mxu0 %v2751_v23 }
 0x61f   :  { %v623_v31 = vmul.f32 1.442695, %v622_v30 }
 0x620   :  { %v788_v32 = vpop.xlane.xlu0 %787 }
 0x621   :  { %2677 = vpow2.f32 %v623_v31  ;;  %v789_v33 = vsub.f32 %v785_v22, %v788_v32 }
 0x623   :  { %v790_v34 = vmul.f32 1.442695, %v789_v33 }
 0x625   :  { %2679 = vpow2.f32 %v790_v34 }
 0x627   :  { %v2676_v35 = vpop.eup %2675 }
 0x628   :  { %v446_v36 = vsel %vm272_vm3, %v2676_v35, 0.0 }
 0x629   :  { %447 = vadd.xlane.f32.xlu0 %v446_v36 }
 0x62b   :  { %v2678_v37 = vpop.eup %2677 }
 0x62c   :  { %v625_v38 = vsel %vm272_vm3, %v2678_v37, 0.0 }
 0x62d   :  { %626 = vadd.xlane.f32.xlu1 %v625_v38 }
 0x62f   :  { %v2680_v41 = vpop.eup %2679 }
 0x630   :  { %v792_v42 = vsel %vm272_vm3, %v2680_v41, 0.0 }
 0x631   :  { %793 = vadd.xlane.f32.xlu0 %v792_v42 }
 0x63e   :  { %797 = vrot.lane.b32.xlu1 %v2917_v48, %s2757_s3 }
 0x647   :  { %630 = vrot.lane.b32.xlu0 %v2917_v48, %s2756_s23 }
 0x6b6   :  { %v448_v43 = vpop.xlane.xlu0 %447 }
 0x6b7   :  { %2681 = vrcp.f32 %v448_v43  ;;  %v2339_v43 = vld [vmem:[%s3261_s11] ss:$0 sm:$0xff] }
 0x6ba   :  { %v627_v44 = vpop.xlane.xlu1 %626 }
 0x6bb   :  { %2683 = vrcp.f32 %v627_v44 }
 0x6be   :  { %v794_v45 = vpop.xlane.xlu0 %793  ;;  %v798_v48 = vpop.permute.xlu1 %797 }
 0x6bf   :  { %2685 = vrcp.f32 %v794_v45 }
 0x6c1   :  { %v2682_v46 = vpop.eup %2681 }
 0x6c2   :  { %v450_v47 = vmul.f32 %v2682_v46, %v2676_v35  ;;  %v631_v49 = vpop.permute.xlu0 %630 }
 0x6c4   :  { %2500 = vmatmul.mubr.msk.f32.vlgmr.msra.gmra.mrb[6].mxu0 %vm272_vm3, %v450_v47 }
 0x6c5   :  { %v2684_v50 = vpop.eup %2683  ;;  %2508 = vmatpush3.msra.mxu0 %v631_v49  ;;  %2509 = vmatprep.mubr.msk.f32.mxu0 %vm2752_vm1, %v2751_v23  ;;  %v2653_v49 = vld [vmem:[%s3264_s14] sm:$0xff]  }
 0x6c6   :  { %v629_v52 = vmul.f32 %v2684_v50, %v2678_v37  ;;  %2517 = vmatprep.subr.mxu0 %v2751_v23  ;;  %v2338_v37 = vld [vmem:[%s3260_s10] ss:$0 sm:$0xff]  ;;  %v2654_v50 = vld [vmem:[%s3264_s14 + $0x8] sm:$0xff]  }
 0x6c8   :  { %2510 = vmatmul.mubr.msk.f32.vlgmr.msra.gmra.mrb[8].mxu0 %vm272_vm3, %v629_v52  ;;  %v2655_v52 = vld [vmem:[%s3264_s14 + $0x10] sm:$0xff]  }
 0x6c9   :  { %v2686_v53 = vpop.eup %2685  ;;  %2518 = vmatpush3.msra.mxu0 %v798_v48  ;;  %2519 = vmatprep.mubr.msk.f32.mxu0 %vm2752_vm1, %v2751_v23  ;;  %v2656_v48 = vld [vmem:[%s3264_s14 + $0x18] sm:$0xff]  }
 0x6ca   :  { %v796_v54 = vmul.f32 %v2686_v53, %v2680_v41  ;;  %2530 = vmatprep.subr.bf16.mxu0 %v2751_v23  ;;  %v2340_v53 = vld [vmem:[%s3280_s24] ss:$0 sm:$0xff] }
 0x6cc   :  { %2520 = vmatmul.mubr.msk.f32.vlgmr.msra.gmra.mrb[10].mxu0 %vm272_vm3, %v796_v54 }
 0x6cd   :  { %2534 = vmatprep.mubr.msk.bf16.mxu0 %vm2752_vm1, %v2751_v23 }
 0x797   :  { %v523_v57 = vpop.f32.mrb[6].mxu0 }
 0x798   :  { %v2501_v58 = vpop.f32.mrb[7].mxu0 }
 0x79b   :  { %v702_v59 = vpop.f32.mrb[8].mxu0 }
 0x79c   :  { %v2511_v60 = vpop.f32.mrb[9].mxu0 }
 0x79f   :  { %v869_v61 = vpop.f32.mrb[10].mxu0 }
 0x7a0   :  { %v2637_v62 = vpack.i.bf16 %v869_v61, %v523_v57  ;;  %v2521_v63 = vpop.f32.mrb[11].mxu0 }
 0x7a2   :  { %2638 = vrot.lane.b32.xlu1 %v2637_v62, %s2758_s29 }
 0x814   :  { %v2639_v0 = vpop.permute.xlu1 %2638 }
 0x815   :  { %v2641_v1 = vunpack.i.h.bf16 %v2639_v0  ;;  %v2640_v2 = vunpack.i.l.bf16 %v2639_v0 }
 0x817   :  { %v877_v3 = vsel %vm189_vm2, %v702_v59, %v2641_v1  ;;  %v531_v4 = vsel %vm189_vm2, %v2963_v6, %v2640_v2 }
 0x818   :  { %v878_v5 = vpack.c.bf16 %v877_v3, %v531_v4 }
 0x81a   :  { %2527 = vmatmul.mubr.msk.bf16.vlgmr.msra.gmra.mrb[8].mxu1 %vm73_vm0, %v878_v5 }
 0x81b   :  { %2546 = vmatprep.mubr.msk.bf16.mxu1 %vm2752_vm1, %v2751_v23  ;;  %2539 = vmatpush3.bf16.msra.mxu1 %v2653_v49 }
 0x81c   :  { %2540 = vmatprep.subr.bf16.mxu1 %v2751_v23 }
 0x81f   :  { %2541 = vmatpush3.bf16.msra.mxu1 %v2654_v50 }
 0x820   :  { %2542 = vmatprep.subr.bf16.mxu1 %v2751_v23 }
 0x823   :  { %2543 = vmatpush3.bf16.msra.mxu1 %v2655_v52 }
 0x824   :  { %2544 = vmatprep.subr.bf16.mxu1 %v2751_v23 }
 0x827   :  { %2545 = vmatpush3.bf16.msra.mxu1 %v2656_v48 }
 0x828   :  { %2568 = vmatprep.subr.mxu1 %v2751_v23 }
 0x8ed   :  { %v939_v8 = vpop.f32.mrb[8].mxu1 }
 0x8ee   :  { %v940_v9 = vadd.f32 %v2334_v7, %v939_v8  ;;  %v2528_v10 = vpop.f32.mrb[9].mxu1 }
 0x8ef   :  { %v942_v11 = vpop.f32.mrb[10].mxu1 }
 0x8f0   :  { %v943_v12 = vadd.f32 %v2334_v7, %v942_v11  ;;  %v2529_v14 = vpop.f32.mrb[11].mxu1  ;;  %v946_v15 = vadd.f32 %v940_v9, %v2899_v39 }
 0x8f2   :  { %v950_v6 = vsel %vm73_vm0, %v946_v15, 0.0  ;;  %v947_v16 = vadd.f32 %v943_v12, %v2901_v40  ;;  %v2651_v40 = vld [vmem:[%s3262_s12] sm:$0xff]  }
 0x8f3   :  { %951 = vadd.xlane.f32.xlu1 %v950_v6  ;;  %2531 = vmatpush3.bf16.msra.mxu0 %v2651_v40 }
 0x8f4   :  { %v953_v17 = vsel %vm73_vm0, %v947_v16, 0.0  ;;  %2532 = vmatprep.subr.bf16.mxu0 %v2751_v23 }
 0x8f5   :  { %954 = vadd.xlane.f32.xlu0 %v953_v17 }
 0x8f7   :  { %2533 = vmatpush3.bf16.msra.mxu0 %v2652_v28 }
 0x8f8   :  { %2550 = vmatprep.subr.bf16.mxu0 %v2751_v23 }
 0x980   :  { %v952_v18 = vpop.xlane.xlu1 %951 }
 0x981   :  { %v956_v19 = vmul.f32 0.03125, %v952_v18 }
 0x982   :  { %v955_v20 = vpop.xlane.xlu0 %954 }
 0x983   :  { %v958_v21 = vsub.f32 %v946_v15, %v956_v19  ;;  %v957_v22 = vmul.f32 0.03125, %v955_v20 }
 0x985   :  { %v959_v24 = vsub.f32 %v947_v16, %v957_v22  ;;  %v960_v25 = vmul.f32 %v958_v21, %v958_v21  ;;  %v2344_v16 = vld [vmem:[%s3265_s15] ss:$0 sm:$0xff] }
 0x987   :  { %v962_v26 = vsel %vm73_vm0, %v960_v25, 0.0  ;;  %v961_v27 = vmul.f32 %v959_v24, %v959_v24 }
 0x988   :  { %963 = vadd.xlane.f32.xlu0 %v962_v26 }
 0x989   :  { %v965_v39 = vsel %vm73_vm0, %v961_v27, 0.0 }
 0x98c   :  { %966 = vadd.xlane.f32.xlu0 %v965_v39 }
 0xa15   :  { %v964_v29 = vpop.xlane.xlu0 %963 }
 0xa16   :  { %v968_v30 = vmul.f32 0.03125, %v964_v29 }
 0xa18   :  { %v970_v31 = vadd.f32 1e-12, %v968_v30 }
 0xa19   :  { %v967_v32 = vpop.xlane.xlu0 %966 }
 0xa1a   :  { %2687 = vrsqrt.f32 %v970_v31  ;;  %v969_v33 = vmul.f32 0.03125, %v967_v32 }
 0xa1c   :  { %v971_v34 = vadd.f32 1e-12, %v969_v33 }
 0xa1e   :  { %2689 = vrsqrt.f32 %v971_v34 }
 0xa24   :  { %v2688_v35 = vpop.eup %2687 }
 0xa25   :  { %v974_v36 = vmul.f32 %v2688_v35, %v958_v21 }
 0xa27   :  { %v982_v41 = vmul.f32 %v2338_v37, %v974_v36  ;;  %v2657_v36 = vld [vmem:[%s3256_s6 + $0x10] sm:$0xff]  }
 0xa28   :  { %v2690_v38 = vpop.eup %2689 }
 0xa29   :  { %v975_v42 = vmul.f32 %v2690_v38, %v959_v24  ;;  %v990_v45 = vadd.f32 %v2339_v43, %v982_v41 }
 0xa2b   :  { %v983_v44 = vmul.f32 %v2338_v37, %v975_v42  ;;  %v2658_v37 = vld [vmem:[%s3256_s6 + $0x18] sm:$0xff]  }
 0xa2d   :  { %v991_v46 = vadd.f32 %v2339_v43, %v983_v44 }
 0xa2f   :  { %v992_v47 = vpack.c.bf16 %v991_v46, %v990_v45 }
 0xa31   :  { %2535 = vmatmul.mubr.msk.bf16.vlgmr.msra.gmra.mrb[12].mxu0 %vm73_vm0, %v992_v47  ;;  %v2350_v47 = vld [vmem:[%s3266_s16] ss:$0 sm:$0xff] }
 0xa32   :  { %2554 = vmatprep.mubr.msk.bf16.mxu0 %vm2752_vm1, %v2751_v23  ;;  %2551 = vmatpush3.bf16.msra.mxu0 %v2657_v36 }
 0xa33   :  { %2552 = vmatprep.subr.bf16.mxu0 %v2751_v23 }
 0xa36   :  { %2553 = vmatpush3.bf16.msra.mxu0 %v2658_v37 }
 0xa37   :  { %2558 = vmatprep.subr.mxu0 %v2751_v23 }
 0xb04   :  { %v1053_v54 = vpop.f32.mrb[12].mxu0 }
 0xb05   :  { %v1054_v55 = vadd.f32 %v2340_v53, %v1053_v54  ;;  %v2536_v56 = vpop.f32.mrb[13].mxu0 }
 0xb06   :  { %v1056_v57 = vpop.f32.mrb[14].mxu0 }
 0xb07   :  { %v1060_v58 = vmul.f32 %v1054_v55, %v1054_v55  ;;  %v1057_v59 = vadd.f32 %v2340_v53, %v1056_v57  ;;  %v2537_v60 = vpop.f32.mrb[15].mxu0  ;;  %v2351_v53 = vld [vmem:[%s3267_s17] ss:$0 sm:$0xff] }
 0xb09   :  { %v1062_v61 = vmul.f32 %v1060_v58, %v1054_v55  ;;  %v1061_v62 = vmul.f32 %v1057_v59, %v1057_v59  ;;  %v2357_v58 = vld [vmem:[%s3257_s7 + $0x1] ss:$0 sm:$0xff] }
 0xb0b   :  { %v1064_v63 = vmul.f32 0.044715, %v1062_v61  ;;  %v1063_v0 = vmul.f32 %v1061_v62, %v1057_v59 }
 0xb0d   :  { %v1066_v1 = vadd.f32 %v1064_v63, %v1054_v55  ;;  %v1065_v2 = vmul.f32 0.044715, %v1063_v0 }
 0xb0f   :  { %v1068_v3 = vmul.f32 0.7978846, %v1066_v1  ;;  %v1067_v4 = vadd.f32 %v1065_v2, %v1057_v59 }
 0xb11   :  { %2691 = vtanh.f32 %v1068_v3  ;;  %v1069_v5 = vmul.f32 0.7978846, %v1067_v4 }
 0xb13   :  { %2693 = vtanh.f32 %v1069_v5 }
 0xb1b   :  { %v2692_v7 = vpop.eup %2691 }
 0xb1c   :  { %v1072_v8 = vadd.f32 1.0, %v2692_v7 }
 0xb1d   :  { %v2694_v9 = vpop.eup %2693 }
 0xb1e   :  { %v1074_v10 = vmul.f32 0.5, %v1072_v8  ;;  %v1073_v11 = vadd.f32 1.0, %v2694_v9 }
 0xb20   :  { %v1075_v12 = vmul.f32 0.5, %v1073_v11  ;;  %v1076_v14 = vmul.f32 %v1074_v10, %v1054_v55 }
 0xb22   :  { %v1077_v15 = vmul.f32 %v1075_v12, %v1057_v59 }
 0xb24   :  { %v1078_v6 = vpack.c.bf16 %v1077_v15, %v1076_v14 }
 0xb26   :  { %2547 = vmatmul.mubr.msk.bf16.vlgmr.msra.gmra.mrb[12].mxu1 %vm1118_vm4, %v1078_v6 }
 0xb27   :  { %2570 = vmatprep.mubr.msk.f32.mxu1 %vm2752_vm1, %v2751_v23 }
 0xbf9   :  { %v1156_v17 = vpop.f32.mrb[12].mxu1 }
 0xbfa   :  { %v1157_v18 = vadd.f32 %v2344_v16, %v1156_v17  ;;  %v2548_v19 = vpop.f32.mrb[13].mxu1 }
 0xbfb   :  { %v1159_v20 = vpop.f32.mrb[14].mxu1 }
 0xbfc   :  { %v1160_v21 = vadd.f32 %v2344_v16, %v1159_v20  ;;  %v2549_v22 = vpop.f32.mrb[15].mxu1  ;;  %v1163_v24 = vadd.f32 %v1157_v18, %v990_v45 }
 0xbfe   :  { %v1167_v25 = vsel %vm73_vm0, %v1163_v24, 0.0  ;;  %v1164_v26 = vadd.f32 %v1160_v21, %v991_v46 }
 0xbff   :  { %1168 = vadd.xlane.f32.xlu1 %v1167_v25 }
 0xc00   :  { %v1170_v27 = vsel %vm73_vm0, %v1164_v26, 0.0 }
 0xc01   :  { %1171 = vadd.xlane.f32.xlu0 %v1170_v27 }
 0xc8c   :  { %v1169_v39 = vpop.xlane.xlu1 %1168 }
 0xc8d   :  { %v1173_v40 = vmul.f32 0.03125, %v1169_v39 }
 0xc8e   :  { %v1172_v28 = vpop.xlane.xlu0 %1171 }
 0xc8f   :  { %v1175_v29 = vsub.f32 %v1163_v24, %v1173_v40  ;;  %v1174_v30 = vmul.f32 0.03125, %v1172_v28 }
 0xc91   :  { %v1176_v31 = vsub.f32 %v1164_v26, %v1174_v30  ;;  %v1177_v32 = vmul.f32 %v1175_v29, %v1175_v29 }
 0xc93   :  { %v1179_v33 = vsel %vm73_vm0, %v1177_v32, 0.0  ;;  %v1178_v34 = vmul.f32 %v1176_v31, %v1176_v31 }
 0xc94   :  { %1180 = vadd.xlane.f32.xlu1 %v1179_v33 }
 0xc95   :  { %v1182_v35 = vsel %vm73_vm0, %v1178_v34, 0.0 }
 0xc96   :  { %1183 = vadd.xlane.f32.xlu0 %v1182_v35 }
 0xd21   :  { %v1181_v38 = vpop.xlane.xlu1 %1180 }
 0xd22   :  { %v1185_v41 = vmul.f32 0.03125, %v1181_v38 }
 0xd23   :  { %v1184_v42 = vpop.xlane.xlu0 %1183 }
 0xd24   :  { %v1187_v43 = vadd.f32 1e-12, %v1185_v41  ;;  %v1186_v44 = vmul.f32 0.03125, %v1184_v42 }
 0xd26   :  { %2695 = vrsqrt.f32 %v1187_v43  ;;  %v1188_v45 = vadd.f32 1e-12, %v1186_v44 }
 0xd28   :  { %2697 = vrsqrt.f32 %v1188_v45 }
 0xd30   :  { %v2696_v46 = vpop.eup %2695 }
 0xd31   :  { %v1191_v49 = vmul.f32 %v2696_v46, %v1175_v29 }
 0xd32   :  { %v2698_v50 = vpop.eup %2697 }
 0xd33   :  { %v1199_v52 = vmul.f32 %v2350_v47, %v1191_v49  ;;  %v1192_v48 = vmul.f32 %v2698_v50, %v1176_v31 }
 0xd35   :  { %v1200_v54 = vmul.f32 %v2350_v47, %v1192_v48  ;;  %v3081_v55 = vadd.f32 %v2351_v53, %v1199_v52 }
 0xd37   :  { %v3083_v56 = vadd.f32 %v2351_v53, %v1200_v54 }
 0xd39   :  { %v1209_v57 = vpack.c.bf16 %v3083_v56, %v3081_v55 }
 0xd3b   :  { %2555 = vmatmul.mubr.msk.bf16.vlgmr.msra.gmra.mrb[16].mxu0 %vm73_vm0, %v1209_v57 }
 0xd3c   :  { %2560 = vmatprep.mubr.msk.f32.mxu0 %vm2752_vm1, %v2751_v23 }
 0xe0e   :  { %v1272_v59 = vpop.f32.mrb[16].mxu0 }
 0xe0f   :  { %v3093_v60 = vadd.f32 %v2357_v58, %v1272_v59  ;;  %v2556_v61 = vpop.f32.mrb[17].mxu0 }
 0xe10   :  { %v1275_v62 = vpop.f32.mrb[18].mxu0 }
 0xe11   :  { %1447 = vrot.lane.b32.xlu0 %v3093_v60, %s2754_s20  ;;  %1280 = vrot.lane.b32.xlu1 %v3093_v60, %s2753_s5  ;;  %v2557_v63 = vpop.f32.mrb[19].mxu0  ;;  %v3099_v0 = vadd.f32 %v2357_v58, %v1275_v62 }
 0xe15   :  { %1445 = vrot.lane.b32.xlu1 %v3093_v60, %s2755_s21  ;;  %1783 = vrot.lane.b32.xlu0 %v3099_v0, %s2755_s21 }
 0xe19   :  { %1618 = vrot.lane.b32.xlu1 %v3099_v0, %s2753_s5 }
 0xe1d   :  { %1785 = vrot.lane.b32.xlu1 %v3099_v0, %s2754_s20  ;;  %s2759_s20 = smov [#allocation2]  }
 0xe1e   :  { %s2302_s21 = sshll.u32 %s2759_s20, 4  ;;  %s2303_s21 = int_to_ptr.vmem [resolvable:$true] %s2302_s21 }
 0xe1f   :  { %p2732_p1 = scmp.lt.s32.totalorder %s2303_s21, %s2303_s21 }
 0xe83   :  { %v1448_v1 = vpop.permute.xlu0 %1447  ;;  %v1281_v2 = vpop.permute.xlu1 %1280 }
 0xe84   :  { %2559 = vmatpush3.xpose.msk.msra.mxu0 %vm189_vm2, %v1281_v2  ;;  %2569 = vmatpush3.xpose.msk.msra.mxu1 %vm189_vm2, %v1448_v1  ;;  %v2659_v2 = vld [vmem:[%s3258_s8 + $0x10] sm:$0xff]  }
 0xe85   :  { %2578 = vmatprep.subr.mxu1 %v2751_v23  ;;  %2563 = vmatprep.subr.mxu0 %v2751_v23 }
 0xe87   :  { %2561 = vmatmul.mubr.msk.f32.vlgmr.msra.gmra.mrb[20].mxu0 %vm189_vm2, %v3093_v60  ;;  %v1446_v3 = vpop.permute.xlu1 %1445  ;;  %v1784_v7 = vpop.permute.xlu0 %1783 }
 0xe88   :  { %2571 = vmatmul.mubr.msk.f32.vlgmr.msra.gmra.mrb[16].mxu1 %vm189_vm2, %v1446_v3  ;;  %2565 = vmatprep.mubr.msk.f32.mxu0 %vm2752_vm1, %v2751_v23 }
 0xe89   :  { %2580 = vmatprep.mubr.msk.f32.mxu1 %vm2752_vm1, %v2751_v23 }
 0xe8b   :  { %v1619_v4 = vpop.permute.xlu1 %1618 }
 0xe8c   :  { %2579 = vmatpush3.xpose.msk.msra.mxu1 %vm189_vm2, %v1619_v4 }
 0xe8d   :  { %2588 = vmatprep.subr.mxu1 %v2751_v23 }
 0xe8f   :  { %2581 = vmatmul.mubr.msk.f32.vlgmr.msra.gmra.mrb[18].mxu1 %vm189_vm2, %v3099_v0  ;;  %v1786_v5 = vpop.permute.xlu1 %1785 }
 0xe90   :  { %2589 = vmatpush3.xpose.msk.msra.mxu1 %vm189_vm2, %v1786_v5  ;;  %2590 = vmatprep.mubr.msk.f32.mxu1 %vm2752_vm1, %v2751_v23  ;;  %v2660_v5 = vld [vmem:[%s3258_s8 + $0x18] sm:$0xff]   ;;  %s2727_s8 = scalar_lea.vmem %s2303_s21, 256 }
 0xe91   :  { %2598 = vmatprep.subr.bf16.mxu1 %v2751_v23  ;;  %p2728_p0 = scmp.ne.s32.totalorder %s2303_s21, %s2727_s8  ;;  %p2733_p2 = scmp.lt.s32.totalorder %s2727_s8, %s2727_s8 }
 0xe93   :  { %2591 = vmatmul.mubr.msk.f32.vlgmr.msra.gmra.mrb[20].mxu1 %vm189_vm2, %v1784_v7  ;;  %p2734_p3 = por %p2733_p2, %p2732_p1 }
 0xe94   :  { %2602 = vmatprep.mubr.msk.bf16.mxu1 %vm2752_vm1, %v2751_v23  ;;  %2599 = vmatpush3.bf16.msra.mxu1 %v2659_v2 }
 0xe95   :  { %2600 = vmatprep.subr.bf16.mxu1 %v2751_v23  ;;  %p2735_p4 = pnand %p2734_p3, %p2728_p0 }
 0xe98   :  { %2601 = vmatpush3.bf16.msra.mxu1 %v2660_v5 }
 0xe99   :  { %2614 = vmatprep.subr.bf16.mxu1 %v2751_v23 }
 0xf5a   :  { %v1352_v8 = vpop.f32.mrb[20].mxu0 }
 0xf5b   :  { %v1356_v9 = vmul.f32 0.25, %v1352_v8  ;;  %v2562_v10 = vpop.f32.mrb[21].mxu0  ;;  %v1519_v11 = vpop.f32.mrb[16].mxu1 }
 0xf5c   :  { %v1523_v12 = vmul.f32 0.25, %v1519_v11  ;;  %v2572_v14 = vpop.f32.mrb[17].mxu1 }
 0xf5d   :  { %v1357_v15 = vadd.f32 %v2932_v51, %v1356_v9 }
 0xf5e   :  { %v1524_v6 = vadd.f32 %v2932_v51, %v1523_v12 }
 0xf5f   :  { %v1358_v16 = vsel %vm272_vm3, %v1357_v15, -inf }
 0xf60   :  { %1359 = vmax.xlane.f32.xlu1 %v1358_v16  ;;  %v1525_v17 = vsel %vm272_vm3, %v1524_v6, -inf }
 0xf61   :  { %1526 = vmax.xlane.f32.xlu0 %v1525_v17 }
 0xf62   :  { %v1690_v18 = vpop.f32.mrb[18].mxu1 }
 0xf63   :  { %v1694_v19 = vmul.f32 0.25, %v1690_v18  ;;  %v2582_v20 = vpop.f32.mrb[19].mxu1 }
 0xf64   :  { %v2378_v20 = vld [vmem:[%s3259_s9 + $0x1] ss:$0 sm:$0xff] }
 0xf65   :  { %v1695_v21 = vadd.f32 %v2969_v13, %v1694_v19 }
 0xf66   :  { %v1857_v22 = vpop.f32.mrb[20].mxu1 }
 0xf67   :  { %v1861_v24 = vmul.f32 0.25, %v1857_v22  ;;  %v2592_v25 = vpop.f32.mrb[21].mxu1  ;;  %v1696_v26 = vsel %vm272_vm3, %v1695_v21, -inf }
 0xf68   :  { %1697 = vmax.xlane.f32.xlu0 %v1696_v26 }
 0xf69   :  { %v1862_v27 = vadd.f32 %v2969_v13, %v1861_v24 }
 0xf6b   :  { %v1863_v51 = vsel %vm272_vm3, %v1862_v27, -inf }
 0xf6c   :  { %1864 = vmax.xlane.f32.xlu0 %v1863_v51 }
 0xf71   :  { %1369 = vrot.lane.b32.xlu1 %v3093_v60, %s2756_s23 }
 0xfed   :  { %v1360_v39 = vpop.xlane.xlu1 %1359 }
 0xfee   :  { %v1361_v40 = vsub.f32 %v1357_v15, %v1360_v39  ;;  %v1527_v28 = vpop.xlane.xlu0 %1526 }
 0xfef   :  { %v1528_v29 = vsub.f32 %v1524_v6, %v1527_v28 }
 0xff0   :  { %v1362_v30 = vmul.f32 1.442695, %v1361_v40 }
 0xff1   :  { %v1529_v31 = vmul.f32 1.442695, %v1528_v29  ;;  %v1370_v32 = vpop.permute.xlu1 %1369 }
 0xff2   :  { %2699 = vpow2.f32 %v1362_v30  ;;  %2564 = vmatpush3.msra.mxu0 %v1370_v32 }
 0xff3   :  { %2701 = vpow2.f32 %v1529_v31  ;;  %2573 = vmatprep.subr.mxu0 %v2751_v23 }
 0xff5   :  { %v1698_v33 = vpop.xlane.xlu0 %1697 }
 0xff6   :  { %v1699_v13 = vsub.f32 %v1695_v21, %v1698_v33 }
 0xff8   :  { %v1700_v34 = vmul.f32 1.442695, %v1699_v13 }
 0xff9   :  { %v1865_v35 = vpop.xlane.xlu0 %1864 }
 0xffa   :  { %2703 = vpow2.f32 %v1700_v34  ;;  %v1866_v36 = vsub.f32 %v1862_v27, %v1865_v35 }
 0xffc   :  { %v2700_v37 = vpop.eup %2699  ;;  %v1867_v38 = vmul.f32 1.442695, %v1866_v36 }
 0xffd   :  { %v2702_v41 = vpop.eup %2701  ;;  %v1364_v42 = vsel %vm272_vm3, %v2700_v37, 0.0 }
 0xffe   :  { %2705 = vpow2.f32 %v1867_v38  ;;  %1365 = vadd.xlane.f32.xlu1 %v1364_v42  ;;  %v1531_v43 = vsel %vm272_vm3, %v2702_v41, 0.0 }
 0xfff   :  { %1532 = vadd.xlane.f32.xlu0 %v1531_v43 }
0x1004   :  { %v2704_v44 = vpop.eup %2703 }
0x1005   :  { %v1702_v45 = vsel %vm272_vm3, %v2704_v44, 0.0 }
0x1006   :  { %1703 = vadd.xlane.f32.xlu1 %v1702_v45 }
0x1008   :  { %v2706_v46 = vpop.eup %2705 }
0x1009   :  { %v1869_v47 = vsel %vm272_vm3, %v2706_v46, 0.0 }
0x100a   :  { %1870 = vadd.xlane.f32.xlu0 %v1869_v47 }
0x1017   :  { %1707 = vrot.lane.b32.xlu1 %v3099_v0, %s2756_s23 }
0x101b   :  { %1874 = vrot.lane.b32.xlu1 %v3099_v0, %s2757_s3 }
0x1020   :  { %1536 = vrot.lane.b32.xlu0 %v3093_v60, %s2757_s3 }
0x108b   :  { %v1366_v49 = vpop.xlane.xlu1 %1365 }
0x108c   :  { %2707 = vrcp.f32 %v1366_v49  ;;  %v1533_v50 = vpop.xlane.xlu0 %1532  ;;  %v2384_v49 = vld [vmem:[%s3260_s10 + $0x1] ss:$0 sm:$0xff] }
0x108d   :  { %2709 = vrcp.f32 %v1533_v50 }
0x1093   :  { %v1704_v52 = vpop.xlane.xlu1 %1703 }
0x1094   :  { %2711 = vrcp.f32 %v1704_v52 }
0x1096   :  { %v2708_v48 = vpop.eup %2707 }
0x1097   :  { %v1368_v53 = vmul.f32 %v2708_v48, %v2700_v37  ;;  %v1871_v54 = vpop.xlane.xlu0 %1870  ;;  %v2710_v57 = vpop.eup %2709  ;;  %v2662_v37 = vld [vmem:[%s3262_s12 + $0x18] sm:$0xff]  }
0x1098   :  { %2713 = vrcp.f32 %v1871_v54  ;;  %v1535_v58 = vmul.f32 %v2710_v57, %v2702_v41  ;;  %v1708_v59 = vpop.permute.xlu1 %1707 }
0x1099   :  { %2566 = vmatmul.mubr.msk.f32.vlgmr.msra.gmra.mrb[22].mxu0 %vm272_vm3, %v1368_v53  ;;  %v2385_v53 = vld [vmem:[%s3261_s11 + $0x1] ss:$0 sm:$0xff] }
0x109a   :  { %2575 = vmatprep.mubr.msk.f32.mxu0 %vm2752_vm1, %v2751_v23 }
0x109b   :  { %v1537_v61 = vpop.permute.xlu0 %1536 }
0x109c   :  { %2574 = vmatpush3.msra.mxu0 %v1537_v61  ;;  %v1875_v63 = vpop.permute.xlu1 %1874  ;;  %v2663_v61 = vld [vmem:[%s3264_s14 + $0x20] sm:$0xff]  }
0x109d   :  { %2576 = vmatmul.mubr.msk.f32.vlgmr.msra.gmra.mrb[24].mxu0 %vm272_vm3, %v1535_v58  ;;  %2583 = vmatprep.subr.mxu0 %v2751_v23 }
0x109e   :  { %v2712_v60 = vpop.eup %2711  ;;  %2584 = vmatpush3.msra.mxu0 %v1708_v59  ;;  %2585 = vmatprep.mubr.msk.f32.mxu0 %vm2752_vm1, %v2751_v23 }
0x109f   :  { %v1706_v62 = vmul.f32 %v2712_v60, %v2704_v44  ;;  %2593 = vmatprep.subr.mxu0 %v2751_v23  ;;  %v2664_v60 = vld [vmem:[%s3264_s14 + $0x28] sm:$0xff]  }
0x10a1   :  { %2586 = vmatmul.mubr.msk.f32.vlgmr.msra.gmra.mrb[26].mxu0 %vm272_vm3, %v1706_v62  ;;  %v2665_v62 = vld [vmem:[%s3264_s14 + $0x30] sm:$0xff]  }
0x10a2   :  { %v2714_v0 = vpop.eup %2713  ;;  %2594 = vmatpush3.msra.mxu0 %v1875_v63  ;;  %2595 = vmatprep.mubr.msk.f32.mxu0 %vm2752_vm1, %v2751_v23  ;;  %v2666_v63 = vld [vmem:[%s3264_s14 + $0x38] sm:$0xff]  }
0x10a3   :  { %v1873_v1 = vmul.f32 %v2714_v0, %v2706_v46  ;;  %2606 = vmatprep.subr.bf16.mxu0 %v2751_v23  ;;  %v2391_v0 = vld [vmem:[%s3280_s24 + $0x1] ss:$0 sm:$0xff] }
0x10a5   :  { %2596 = vmatmul.mubr.msk.f32.vlgmr.msra.gmra.mrb[28].mxu0 %vm272_vm3, %v1873_v1 }
0x10a6   :  { %2610 = vmatprep.mubr.msk.bf16.mxu0 %vm2752_vm1, %v2751_v23 }
0x116c   :  { %v1441_v3 = vpop.f32.mrb[22].mxu0 }
0x116d   :  { %v2567_v4 = vpop.f32.mrb[23].mxu0 }
0x1170   :  { %v1608_v7 = vpop.f32.mrb[24].mxu0 }
0x1171   :  { %v2577_v8 = vpop.f32.mrb[25].mxu0 }
0x1174   :  { %v1779_v9 = vpop.f32.mrb[26].mxu0 }
0x1175   :  { %v2587_v10 = vpop.f32.mrb[27].mxu0 }
0x1178   :  { %v1946_v11 = vpop.f32.mrb[28].mxu0 }
0x1179   :  { %v2642_v12 = vpack.i.bf16 %v1946_v11, %v1608_v7  ;;  %v2597_v14 = vpop.f32.mrb[29].mxu0 }
0x117b   :  { %2643 = vrot.lane.b32.xlu1 %v2642_v12, %s2758_s29 }
0x11ed   :  { %v2644_v15 = vpop.permute.xlu1 %2643 }
0x11ee   :  { %v2646_v6 = vunpack.i.h.bf16 %v2644_v15  ;;  %v2645_v16 = vunpack.i.l.bf16 %v2644_v15 }
0x11f0   :  { %v1954_v17 = vsel %vm189_vm2, %v1779_v9, %v2646_v6  ;;  %v1616_v18 = vsel %vm189_vm2, %v1441_v3, %v2645_v16 }
0x11f1   :  { %v1955_v19 = vpack.c.bf16 %v1954_v17, %v1616_v18 }
0x11f3   :  { %2603 = vmatmul.mubr.msk.bf16.vlgmr.msra.gmra.mrb[24].mxu1 %vm73_vm0, %v1955_v19 }
0x11f4   :  { %2622 = vmatprep.mubr.msk.bf16.mxu1 %vm2752_vm1, %v2751_v23  ;;  %2615 = vmatpush3.bf16.msra.mxu1 %v2663_v61 }
0x11f5   :  { %2616 = vmatprep.subr.bf16.mxu1 %v2751_v23 }
0x11f8   :  { %2617 = vmatpush3.bf16.msra.mxu1 %v2664_v60 }
0x11f9   :  { %2618 = vmatprep.subr.bf16.mxu1 %v2751_v23 }
0x11fc   :  { %2619 = vmatpush3.bf16.msra.mxu1 %v2665_v62 }
0x11fd   :  { %2620 = vmatprep.subr.bf16.mxu1 %v2751_v23 }
0x1200   :  { %2621 = vmatpush3.bf16.msra.mxu1 %v2666_v63 }
0x12c6   :  { %v2018_v21 = vpop.f32.mrb[24].mxu1 }
0x12c7   :  { %v2019_v22 = vadd.f32 %v2378_v20, %v2018_v21  ;;  %v2604_v24 = vpop.f32.mrb[25].mxu1 }
0x12c8   :  { %v2021_v25 = vpop.f32.mrb[26].mxu1 }
0x12c9   :  { %v2022_v26 = vadd.f32 %v2378_v20, %v2021_v25  ;;  %v2605_v27 = vpop.f32.mrb[27].mxu1  ;;  %v2025_v51 = vadd.f32 %v2019_v22, %v3081_v55 }
0x12ca   :  { %v2404_v27 = vld [vmem:[%s3265_s15 + $0x1] ss:$0 sm:$0xff] }
0x12cb   :  { %v2031_v39 = vsel %vm73_vm0, %v2025_v51, 0.0  ;;  %v2026_v40 = vadd.f32 %v2022_v26, %v3083_v56  ;;  %v2661_v56 = vld [vmem:[%s3262_s12 + $0x10] sm:$0xff]  }
0x12cc   :  { %2032 = vadd.xlane.f32.xlu0 %v2031_v39  ;;  %2607 = vmatpush3.bf16.msra.mxu0 %v2661_v56 }
0x12cd   :  { %v2034_v28 = vsel %vm73_vm0, %v2026_v40, 0.0  ;;  %2608 = vmatprep.subr.bf16.mxu0 %v2751_v23 }
0x12ce   :  { %2035 = vadd.xlane.f32.xlu1 %v2034_v28 }
0x12d0   :  { %2609 = vmatpush3.bf16.msra.mxu0 %v2662_v37 }
0x1359   :  { %v2033_v29 = vpop.xlane.xlu0 %2032 }
0x135a   :  { %v2037_v30 = vmul.f32 0.03125, %v2033_v29 }
0x135b   :  { %v2036_v31 = vpop.xlane.xlu1 %2035 }
0x135c   :  { %v2039_v32 = vsub.f32 %v2025_v51, %v2037_v30  ;;  %v2038_v33 = vmul.f32 0.03125, %v2036_v31 }
0x135e   :  { %v2040_v13 = vsub.f32 %v2026_v40, %v2038_v33  ;;  %v2041_v34 = vmul.f32 %v2039_v32, %v2039_v32 }
0x1360   :  { %v2043_v35 = vsel %vm73_vm0, %v2041_v34, 0.0  ;;  %v2042_v36 = vmul.f32 %v2040_v13, %v2040_v13 }
0x1361   :  { %2044 = vadd.xlane.f32.xlu0 %v2043_v35 }
0x1362   :  { %v2046_v55 = vsel %vm73_vm0, %v2042_v36, 0.0 }
0x1365   :  { %2047 = vadd.xlane.f32.xlu0 %v2046_v55 }
0x13ee   :  { %v2045_v38 = vpop.xlane.xlu0 %2044 }
0x13ef   :  { %v2049_v41 = vmul.f32 0.03125, %v2045_v38 }
0x13f1   :  { %v2051_v42 = vadd.f32 1e-12, %v2049_v41 }
0x13f2   :  { %v2048_v43 = vpop.xlane.xlu0 %2047 }
0x13f3   :  { %2715 = vrsqrt.f32 %v2051_v42  ;;  %v2050_v44 = vmul.f32 0.03125, %v2048_v43 }
0x13f5   :  { %v2052_v45 = vadd.f32 1e-12, %v2050_v44 }
0x13f7   :  { %2717 = vrsqrt.f32 %v2052_v45 }
0x13fd   :  { %v2716_v46 = vpop.eup %2715 }
0x13fe   :  { %v2055_v47 = vmul.f32 %v2716_v46, %v2039_v32 }
0x1400   :  { %v2063_v52 = vmul.f32 %v2384_v49, %v2055_v47 }
0x1401   :  { %v2718_v50 = vpop.eup %2717 }
0x1402   :  { %v2056_v48 = vmul.f32 %v2718_v50, %v2040_v13  ;;  %v2071_v57 = vadd.f32 %v2385_v53, %v2063_v52 }
0x1404   :  { %v2064_v54 = vmul.f32 %v2384_v49, %v2056_v48  ;;  %v2412_v48 = vld [vmem:[%s3266_s16 + $0x1] ss:$0 sm:$0xff] }
0x1406   :  { %v2072_v58 = vadd.f32 %v2385_v53, %v2064_v54 }
0x1408   :  { %v2073_v59 = vpack.c.bf16 %v2072_v58, %v2071_v57 }
0x140a   :  { %2611 = vmatmul.mubr.msk.bf16.vlgmr.msra.gmra.mrb[32].mxu0 %vm73_vm0, %v2073_v59 }
0x14dd   :  { %v2136_v1 = vpop.f32.mrb[32].mxu0 }
0x14de   :  { %v2137_v2 = vadd.f32 %v2391_v0, %v2136_v1  ;;  %v2612_v3 = vpop.f32.mrb[33].mxu0 }
0x14df   :  { %v2139_v4 = vpop.f32.mrb[34].mxu0 }
0x14e0   :  { %v2143_v5 = vmul.f32 %v2137_v2, %v2137_v2  ;;  %v2140_v7 = vadd.f32 %v2391_v0, %v2139_v4  ;;  %v2613_v8 = vpop.f32.mrb[35].mxu0 }
0x14e2   :  { %v2145_v9 = vmul.f32 %v2143_v5, %v2137_v2  ;;  %v2144_v10 = vmul.f32 %v2140_v7, %v2140_v7 }
0x14e4   :  { %v2147_v11 = vmul.f32 0.044715, %v2145_v9  ;;  %v2146_v23 = vmul.f32 %v2144_v10, %v2140_v7 }
0x14e6   :  { %v2149_v12 = vadd.f32 %v2147_v11, %v2137_v2  ;;  %v2148_v14 = vmul.f32 0.044715, %v2146_v23 }
0x14e8   :  { %v2151_v15 = vmul.f32 0.7978846, %v2149_v12  ;;  %v2150_v6 = vadd.f32 %v2148_v14, %v2140_v7 }
0x14ea   :  { %2719 = vtanh.f32 %v2151_v15  ;;  %v2152_v16 = vmul.f32 0.7978846, %v2150_v6 }
0x14ec   :  { %2721 = vtanh.f32 %v2152_v16 }
0x14f4   :  { %v2720_v17 = vpop.eup %2719 }
0x14f5   :  { %v2155_v18 = vadd.f32 1.0, %v2720_v17 }
0x14f6   :  { %v2722_v19 = vpop.eup %2721 }
0x14f7   :  { %v2157_v20 = vmul.f32 0.5, %v2155_v18  ;;  %v2156_v21 = vadd.f32 1.0, %v2722_v19 }
0x14f9   :  { %v2158_v22 = vmul.f32 0.5, %v2156_v21  ;;  %v2159_v24 = vmul.f32 %v2157_v20, %v2137_v2 }
0x14fb   :  { %v2160_v25 = vmul.f32 %v2158_v22, %v2140_v7 }
0x14fd   :  { %v2161_v26 = vpack.c.bf16 %v2160_v25, %v2159_v24 }
0x14ff   :  { %2623 = vmatmul.mubr.msk.bf16.vlgmr.msra.gmra.mrb[28].mxu1 %vm1118_vm4, %v2161_v26 }
0x15d2   :  { %v2240_v51 = vpop.f32.mrb[28].mxu1 }
0x15d3   :  { %v2241_v39 = vadd.f32 %v2404_v27, %v2240_v51  ;;  %v2624_v40 = vpop.f32.mrb[29].mxu1 }
0x15d4   :  { %v2243_v28 = vpop.f32.mrb[30].mxu1 }
0x15d5   :  { %v2244_v29 = vadd.f32 %v2404_v27, %v2243_v28  ;;  %v2625_v30 = vpop.f32.mrb[31].mxu1  ;;  %v2247_v31 = vadd.f32 %v2241_v39, %v2071_v57  ;;  %v2413_v57 = vld [vmem:[%s3267_s17 + $0x1] ss:$0 sm:$0xff] }
0x15d7   :  { %v2253_v32 = vsel %vm73_vm0, %v2247_v31, 0.0  ;;  %v2248_v33 = vadd.f32 %v2244_v29, %v2072_v58 }
0x15d8   :  { %2254 = vadd.xlane.f32.xlu0 %v2253_v32 }
0x15d9   :  { %v2256_v13 = vsel %vm73_vm0, %v2248_v33, 0.0 }
0x15da   :  { %2257 = vadd.xlane.f32.xlu1 %v2256_v13 }
0x1665   :  { %v2255_v34 = vpop.xlane.xlu0 %2254 }
0x1666   :  { %v2259_v35 = vmul.f32 0.03125, %v2255_v34 }
0x1667   :  { %v2258_v36 = vpop.xlane.xlu1 %2257 }
0x1668   :  { %v2261_v55 = vsub.f32 %v2247_v31, %v2259_v35  ;;  %v2260_v56 = vmul.f32 0.03125, %v2258_v36 }
0x166a   :  { %v2262_v37 = vsub.f32 %v2248_v33, %v2260_v56  ;;  %v2263_v38 = vmul.f32 %v2261_v55, %v2261_v55 }
0x166c   :  { %v2265_v41 = vsel %vm73_vm0, %v2263_v38, 0.0  ;;  %v2264_v42 = vmul.f32 %v2262_v37, %v2262_v37 }
0x166d   :  { %2266 = vadd.xlane.f32.xlu0 %v2265_v41 }
0x166e   :  { %v2268_v43 = vsel %vm73_vm0, %v2264_v42, 0.0 }
0x166f   :  { %2269 = vadd.xlane.f32.xlu1 %v2268_v43 }
0x16fa   :  { %v2267_v44 = vpop.xlane.xlu0 %2266 }
0x16fb   :  { %v2271_v45 = vmul.f32 0.03125, %v2267_v44 }
0x16fc   :  { %v2270_v46 = vpop.xlane.xlu1 %2269 }
0x16fd   :  { %v2273_v47 = vadd.f32 1e-12, %v2271_v45  ;;  %v2272_v49 = vmul.f32 0.03125, %v2270_v46 }
0x16ff   :  { %2723 = vrsqrt.f32 %v2273_v47  ;;  %v2274_v50 = vadd.f32 1e-12, %v2272_v49 }
0x1701   :  { %2725 = vrsqrt.f32 %v2274_v50 }
0x1709   :  { %v2724_v52 = vpop.eup %2723 }
0x170a   :  { %v2277_v53 = vmul.f32 %v2724_v52, %v2261_v55 }
0x170b   :  { %v2726_v54 = vpop.eup %2725 }
0x170c   :  { %v2278_v58 = vmul.f32 %v2726_v54, %v2262_v37  ;;  %v2285_v59 = vmul.f32 %v2412_v48, %v2277_v53 }
0x170e   :  { %v2286_v61 = vmul.f32 %v2412_v48, %v2278_v58  ;;  %v2293_v60 = vadd.f32 %v2413_v57, %v2285_v59 }
0x1710   :  { %v2294_v62 = vadd.f32 %v2413_v57, %v2286_v61  ;;  %2295 = vst.msk [vmem:[#allocation2] sm:$0xff] %vm73_vm0, %v2293_v60 }
0x1712   :  { %2296 = vst.msk [vmem:[#allocation2 + $0x8] sm:$0xff] %vm73_vm0, %v2294_v62 }
0x1713   :  { %2738 = shalt.err (!%p2735_p4)
}
0x1714   :  { %s2739_s23 = scalar_lea.hbm %s3268_s18, 256 }
0x1715   :  { %p2740_p5 = scmp.ne.s32.totalorder %s3268_s18, %s2739_s23  ;;  %p2743_p6 = scmp.lt.u32.totalorder %s2739_s23, %s3268_s18 }
0x1717   :  { %p2745_p7 = pnand %p2743_p6, %p2740_p5 }
0x1719   :  { %2748 = shalt.err (!%p2745_p7)
}
0x171a   :  { %s2760_s25 = smov 128   ;;  %s2761_s13 = smov 8  }
0x171b   :  { %2308 = dma.vmem_to_hbm [thread:$0]  %s2303_s21, 256, %s3268_s18, [#allocation3], %s2760_s25, %s2760_s25, %s2761_s13  }
0x171c   :  { %2749 = dma.done.wait [#allocation3], 256  }
0x171d   :  { %2750 = vsyncadd [#allocation3], 4294967040 }
0x171e   :  { %2312 = vsyncpa [#allocation3], 1 }

</bundles_post_ra>
